<compile_context>
chip_gen: v5e
topology: v5e:2x2
jax: 0.10.0
libtpu: 0.0.40
codegen_flags: <defaults>
</compile_context>

<pallas_src>
import functools
import math

import jax
import jax.numpy as jnp
from jax.experimental import pallas as pl
from jax.experimental.pallas import tpu as pltpu


def _layer_norm(x, g, b, eps=1e-5):
    mu = jnp.mean(x, axis=-1, keepdims=True)
    xc = x - mu
    var = jnp.mean(xc * xc, axis=-1, keepdims=True)
    return xc * jax.lax.rsqrt(var + eps) * g + b


def _fused_forward_kernel(
        x_ref,                       # (S*B*C, F) rows ordered time-major: (s, b, c)
        bn_scale_ref, bn_shift_ref,  # (1, F) folded eval-mode BatchNorm1d
        w1_ref, b1_ref,              # (F, H), (1, H)    linear1
        wi_ref, bi_ref,              # (H, 3H), (1, 3H)  GRU x-side [r|z|n], biases folded
        wh_ref, bhn_ref,             # (H, 3H), (1, H)   GRU h-side [r|z|n], bhn separate
        w2_ref, b2_ref,              # (H, H), (1, H)    linear2
        cls_ref,                     # (1, H)            cls_emb
        wq_ref, bq_ref, wk_ref, bk_ref, wv_ref, bv_ref, wo_ref, bo_ref,
        ln1_g_ref, ln1_b_ref,
        wf1_ref, bf1_ref, wf2_ref, bf2_ref,
        ln2_g_ref, ln2_b_ref,
        lnf_g_ref, lnf_b_ref,
        wc_ref, bc_ref,              # (H, A), (1, A)    classifier
        out_ref,                     # out: (B, A)
        emb_ref,                     # out: (B*C, H)  (client embeddings)
        seq_ref, attn_ref,           # scratch VMEM (B*(C+1), H) each
        *, n_head):
    B = out_ref.shape[0]
    N, H = emb_ref.shape            # N = B*C
    C = N // B
    L = C + 1                       # cls token + clients
    S = x_ref.shape[0] // N
    hd = H // n_head
    f32 = jnp.float32

    # ------------------------- Client_Encoder -------------------------
    x = x_ref[...] * bn_scale_ref[...] + bn_shift_ref[...]            # folded BN (eval)
    x = jnp.dot(x, w1_ref[...], preferred_element_type=f32) + b1_ref[...]
    x = jnp.maximum(x, 0.0)                                            # (S*N, H)

    # GRU input-side projections hoisted out of the serial loop: one big matmul.
    gx = jnp.dot(x, wi_ref[...], preferred_element_type=f32) + bi_ref[...]   # (S*N, 3H)

    wh = wh_ref[...]
    bhn = bhn_ref[...]
    h = jnp.zeros((N, H), f32)
    for t in range(S):                                                 # sequential GRU steps
        g = gx[t * N:(t + 1) * N, :]                                   # (N, 3H), aligned slice
        gh = jnp.dot(h, wh, preferred_element_type=f32)                # one MXU push per step
        r = jax.nn.sigmoid(g[:, 0:H] + gh[:, 0:H])
        z = jax.nn.sigmoid(g[:, H:2 * H] + gh[:, H:2 * H])
        n = jnp.tanh(g[:, 2 * H:3 * H] + r * (gh[:, 2 * H:3 * H] + bhn))
        h = (1.0 - z) * n + z * h

    emb = jnp.dot(h, w2_ref[...], preferred_element_type=f32) + b2_ref[...]  # (N, H)
    emb_ref[...] = emb

    # ------------------------- Transformer head -------------------------
    # Build [cls ; clients_b] sequence rows, 2-D (B*L, H) layout (H stays on lanes).
    for b in range(B):
        seq_ref[b * L:b * L + 1, :] = cls_ref[...]
        seq_ref[b * L + 1:(b + 1) * L, :] = emb[b * C:(b + 1) * C, :]
    xf = seq_ref[...]                                                  # (B*L, H)

    scale = 1.0 / math.sqrt(hd)
    q = (jnp.dot(xf, wq_ref[...], preferred_element_type=f32) + bq_ref[...]) * scale
    k = jnp.dot(xf, wk_ref[...], preferred_element_type=f32) + bk_ref[...]
    v = jnp.dot(xf, wv_ref[...], preferred_element_type=f32) + bv_ref[...]

    # Per-(batch, head) attention; head context folded straight into the output
    # projection rows so heads are never concatenated / transposed.
    for b in range(B):
        rows = slice(b * L, (b + 1) * L)
        acc = jnp.zeros((L, H), f32)
        for hh in range(n_head):
            cols = slice(hh * hd, (hh + 1) * hd)
            qh = q[rows, cols]                                         # (L, hd)
            kh = k[rows, cols]
            vh = v[rows, cols]
            s = jax.lax.dot_general(qh, kh, (((1,), (1,)), ((), ())),
                                    preferred_element_type=f32)        # (L, L) = q @ k^T
            s = s - jnp.max(s, axis=-1, keepdims=True)
            p = jnp.exp(s)
            p = p / jnp.sum(p, axis=-1, keepdims=True)
            ctx = jnp.dot(p, vh, preferred_element_type=f32)           # (L, hd)
            acc = acc + jnp.dot(ctx, wo_ref[cols, :], preferred_element_type=f32)
        attn_ref[rows, :] = acc
    attn_out = attn_ref[...] + bo_ref[...]

    # post-norm TransformerEncoderLayer + final encoder LayerNorm (no dummy operand)
    y1 = _layer_norm(xf + attn_out, ln1_g_ref[...], ln1_b_ref[...])
    f = jnp.dot(y1, wf1_ref[...], preferred_element_type=f32) + bf1_ref[...]
    f = jnp.maximum(f, 0.0)
    f = jnp.dot(f, wf2_ref[...], preferred_element_type=f32) + bf2_ref[...]
    y2 = _layer_norm(y1 + f, ln2_g_ref[...], ln2_b_ref[...])
    y3 = _layer_norm(y2, lnf_g_ref[...], lnf_b_ref[...])

    # emb_agg = x[0] : the cls-token row of each batch element -> classifier.
    for b in range(B):
        cls_b = y3[b * L:b * L + 1, :]                                 # (1, H)
        out_ref[b:b + 1, :] = (jnp.dot(cls_b, wc_ref[...], preferred_element_type=f32)
                               + bc_ref[...])


# ----------------------------- wrapper -----------------------------

def mixrx_transformer_forward(inp, params, *, n_head):
    """inp: (batch, n_clients, n_feature, seq_len). Returns (logits, client_emb)."""
    B, C, F, S = inp.shape
    H = params['lin1_w'].shape[1]
    A = params['head_w'].shape[1]
    N = B * C
    L = C + 1

    # (B, C, F, S) -> time-major rows (s, b, c): one tiny host-side transpose (~4 KB).
    x_rows = jnp.transpose(inp, (3, 0, 1, 2)).reshape(S * N, F)

    # eval-mode BatchNorm1d folded into per-feature scale/shift
    # TODO(synk): training-mode BatchNorm batch statistics / stochastic Dropout not modeled.
    inv_std = jax.lax.rsqrt(params['bn_var'] + 1e-5)
    bn_scale = (params['bn_gamma'] * inv_std).reshape(1, F)
    bn_shift = (params['bn_beta'] - params['bn_mean'] * params['bn_gamma'] * inv_std).reshape(1, F)

    # GRU weight/bias folding (r|z|n order, matching torch.nn.GRU)
    g = params['gru']
    wi_cat = jnp.concatenate([g['wir'], g['wiz'], g['win']], axis=1)               # (H, 3H)
    wh_cat = jnp.concatenate([g['whr'], g['whz'], g['whn']], axis=1)               # (H, 3H)
    bi_cat = jnp.concatenate([g['bir'] + g['bhr'], g['biz'] + g['bhz'], g['bin']], axis=1)

    out, emb_flat = pl.pallas_call(
        functools.partial(_fused_forward_kernel, n_head=n_head),
        out_shape=(jax.ShapeDtypeStruct((B, A), jnp.float32),
                   jax.ShapeDtypeStruct((N, H), jnp.float32)),
        scratch_shapes=[pltpu.VMEM((B * L, H), jnp.float32),
                        pltpu.VMEM((B * L, H), jnp.float32)],
    )(x_rows, bn_scale, bn_shift,
      params['lin1_w'], params['lin1_b'],
      wi_cat, bi_cat, wh_cat, g['bhn'],
      params['lin2_w'], params['lin2_b'],
      params['cls'],
      params['wq'], params['bq'], params['wk'], params['bk'],
      params['wv'], params['bv'], params['wo'], params['bo'],
      params['ln1_g'], params['ln1_b'],
      params['ffn_w1'], params['ffn_b1'], params['ffn_w2'], params['ffn_b2'],
      params['ln2_g'], params['ln2_b'],
      params['lnf_g'], params['lnf_b'],
      params['head_w'], params['head_b'])
    return out, emb_flat.reshape(B, C, H)


# ----------------------------- deterministic params -----------------------------

def init_params(key, *, n_feature, n_hidden, dim_ff, n_activities):
    keys = iter(jax.random.split(key, 64))

    def nrm(shape, scale=0.1):
        return jax.random.normal(next(keys), shape, jnp.float32) * scale

    F, H, DF, A = n_feature, n_hidden, dim_ff, n_activities
    # TODO(synk): pos_emb / pos_weight re-weighting (forward(pos != None)) not modeled
    # (default pos=None path); Client_Encoder is called with its single-arg forward.
    return dict(
        bn_gamma=1.0 + nrm((F,)), bn_beta=nrm((F,)),
        bn_mean=nrm((F,)), bn_var=0.5 + jax.random.uniform(next(keys), (F,), jnp.float32),
        lin1_w=nrm((F, H)), lin1_b=nrm((1, H)),
        gru=dict(
            wir=nrm((H, H)), wiz=nrm((H, H)), win=nrm((H, H)),
            whr=nrm((H, H)), whz=nrm((H, H)), whn=nrm((H, H)),
            bir=nrm((1, H)), biz=nrm((1, H)), bin=nrm((1, H)),
            bhr=nrm((1, H)), bhz=nrm((1, H)), bhn=nrm((1, H)),
        ),
        lin2_w=nrm((H, H)), lin2_b=nrm((1, H)),
        cls=nrm((1, H)),
        wq=nrm((H, H)), bq=nrm((1, H)),
        wk=nrm((H, H)), bk=nrm((1, H)),
        wv=nrm((H, H)), bv=nrm((1, H)),
        wo=nrm((H, H)), bo=nrm((1, H)),
        ln1_g=1.0 + nrm((1, H)), ln1_b=nrm((1, H)),
        ffn_w1=nrm((H, DF)), ffn_b1=nrm((1, DF)),
        ffn_w2=nrm((DF, H)), ffn_b2=nrm((1, H)),
        ln2_g=1.0 + nrm((1, H)), ln2_b=nrm((1, H)),
        lnf_g=1.0 + nrm((1, H)), lnf_b=nrm((1, H)),
        head_w=nrm((H, A)), head_b=nrm((1, A)),
    )


# ----------------------------- main -----------------------------

if __name__ == "__main__":
    # inp: (batch, n_clients, n_feature, seq_len)
    B, C, F, S = 2, 4, 16, 8
    H, NH, A = 32, 4, 6
    DF = H   # MixRx_Transformer: dim_feedforward = n_hidden

    key = jax.random.PRNGKey(0)
    pkey, xkey = jax.random.split(key)
    params = init_params(pkey, n_feature=F, n_hidden=H, dim_ff=DF, n_activities=A)
    inp = jax.random.normal(xkey, (B, C, F, S), jnp.float32)

    fwd = jax.jit(functools.partial(mixrx_transformer_forward, n_head=NH))
    out, emb = fwd(inp, params)
    jax.block_until_ready((out, emb))

    assert out.shape == (B, A), out.shape
    assert emb.shape == (B, C, H), emb.shape
    assert bool(jnp.all(jnp.isfinite(out))) and bool(jnp.all(jnp.isfinite(emb)))
    print("KERNEL_OK")
</pallas_src>

<mosaic_0001>
module attributes {stable_mosaic.version = 11 : i64} {
  func.func @_fused_forward_kernel(%arg0: memref<64x16xf32, #tpu.memory_space<vmem>>, %arg1: memref<1x16xf32, #tpu.memory_space<vmem>>, %arg2: memref<1x16xf32, #tpu.memory_space<vmem>>, %arg3: memref<16x32xf32, #tpu.memory_space<vmem>>, %arg4: memref<1x32xf32, #tpu.memory_space<vmem>>, %arg5: memref<32x96xf32, #tpu.memory_space<vmem>>, %arg6: memref<1x96xf32, #tpu.memory_space<vmem>>, %arg7: memref<32x96xf32, #tpu.memory_space<vmem>>, %arg8: memref<1x32xf32, #tpu.memory_space<vmem>>, %arg9: memref<32x32xf32, #tpu.memory_space<vmem>>, %arg10: memref<1x32xf32, #tpu.memory_space<vmem>>, %arg11: memref<1x32xf32, #tpu.memory_space<vmem>>, %arg12: memref<32x32xf32, #tpu.memory_space<vmem>>, %arg13: memref<1x32xf32, #tpu.memory_space<vmem>>, %arg14: memref<32x32xf32, #tpu.memory_space<vmem>>, %arg15: memref<1x32xf32, #tpu.memory_space<vmem>>, %arg16: memref<32x32xf32, #tpu.memory_space<vmem>>, %arg17: memref<1x32xf32, #tpu.memory_space<vmem>>, %arg18: memref<32x32xf32, #tpu.memory_space<vmem>>, %arg19: memref<1x32xf32, #tpu.memory_space<vmem>>, %arg20: memref<1x32xf32, #tpu.memory_space<vmem>>, %arg21: memref<1x32xf32, #tpu.memory_space<vmem>>, %arg22: memref<32x32xf32, #tpu.memory_space<vmem>>, %arg23: memref<1x32xf32, #tpu.memory_space<vmem>>, %arg24: memref<32x32xf32, #tpu.memory_space<vmem>>, %arg25: memref<1x32xf32, #tpu.memory_space<vmem>>, %arg26: memref<1x32xf32, #tpu.memory_space<vmem>>, %arg27: memref<1x32xf32, #tpu.memory_space<vmem>>, %arg28: memref<1x32xf32, #tpu.memory_space<vmem>>, %arg29: memref<1x32xf32, #tpu.memory_space<vmem>>, %arg30: memref<32x6xf32, #tpu.memory_space<vmem>>, %arg31: memref<1x6xf32, #tpu.memory_space<vmem>>, %arg32: memref<2x6xf32, #tpu.memory_space<vmem>>, %arg33: memref<8x32xf32, #tpu.memory_space<vmem>>, %arg34: memref<10x32xf32, #tpu.memory_space<vmem>>, %arg35: memref<10x32xf32, #tpu.memory_space<vmem>>) attributes {dimension_semantics = [], scalar_prefetch = 0 : i64, scratch_operands = 2 : i64, tpu.core_type = #tpu.core_type<tc>} {
    %c0 = arith.constant 0 : index
    %c0_0 = arith.constant 0 : index
    %0 = vector.load %arg0[%c0, %c0_0] : memref<64x16xf32, #tpu.memory_space<vmem>>, vector<64x16xf32>
    %c0_1 = arith.constant 0 : index
    %c0_2 = arith.constant 0 : index
    %1 = vector.load %arg1[%c0_1, %c0_2] : memref<1x16xf32, #tpu.memory_space<vmem>>, vector<1x16xf32>
    %2 = vector.broadcast %1 : vector<1x16xf32> to vector<64x16xf32>
    %3 = arith.mulf %0, %2 : vector<64x16xf32>
    %c0_3 = arith.constant 0 : index
    %c0_4 = arith.constant 0 : index
    %4 = vector.load %arg2[%c0_3, %c0_4] : memref<1x16xf32, #tpu.memory_space<vmem>>, vector<1x16xf32>
    %5 = vector.broadcast %4 : vector<1x16xf32> to vector<64x16xf32>
    %6 = arith.addf %3, %5 : vector<64x16xf32>
    %c0_5 = arith.constant 0 : index
    %c0_6 = arith.constant 0 : index
    %7 = vector.load %arg3[%c0_5, %c0_6] : memref<16x32xf32, #tpu.memory_space<vmem>>, vector<16x32xf32>
    %cst = arith.constant dense<0.000000e+00> : vector<64x32xf32>
    %8 = tpu.matmul %6, %7, %cst {dimension_numbers = #tpu.dot_dimension_numbers<[1], [0], [0], [1], [0, 0, 1, 1], [], []>} : vector<64x16xf32>, vector<16x32xf32>, vector<64x32xf32> -> vector<64x32xf32>
    %c0_7 = arith.constant 0 : index
    %c0_8 = arith.constant 0 : index
    %9 = vector.load %arg4[%c0_7, %c0_8] : memref<1x32xf32, #tpu.memory_space<vmem>>, vector<1x32xf32>
    %10 = vector.broadcast %9 : vector<1x32xf32> to vector<64x32xf32>
    %11 = arith.addf %8, %10 : vector<64x32xf32>
    %cst_9 = arith.constant 0.000000e+00 : f32
    %12 = vector.broadcast %cst_9 : f32 to vector<64x32xf32>
    %13 = arith.maximumf %11, %12 : vector<64x32xf32>
    %c0_10 = arith.constant 0 : index
    %c0_11 = arith.constant 0 : index
    %14 = vector.load %arg5[%c0_10, %c0_11] : memref<32x96xf32, #tpu.memory_space<vmem>>, vector<32x96xf32>
    %cst_12 = arith.constant dense<0.000000e+00> : vector<64x96xf32>
    %15 = tpu.matmul %13, %14, %cst_12 {dimension_numbers = #tpu.dot_dimension_numbers<[1], [0], [0], [1], [0, 0, 1, 1], [], []>} : vector<64x32xf32>, vector<32x96xf32>, vector<64x96xf32> -> vector<64x96xf32>
    %c0_13 = arith.constant 0 : index
    %c0_14 = arith.constant 0 : index
    %16 = vector.load %arg6[%c0_13, %c0_14] : memref<1x96xf32, #tpu.memory_space<vmem>>, vector<1x96xf32>
    %17 = vector.broadcast %16 : vector<1x96xf32> to vector<64x96xf32>
    %18 = arith.addf %15, %17 : vector<64x96xf32>
    %c0_15 = arith.constant 0 : index
    %c0_16 = arith.constant 0 : index
    %19 = vector.load %arg7[%c0_15, %c0_16] : memref<32x96xf32, #tpu.memory_space<vmem>>, vector<32x96xf32>
    %c0_17 = arith.constant 0 : index
    %c0_18 = arith.constant 0 : index
    %20 = vector.load %arg8[%c0_17, %c0_18] : memref<1x32xf32, #tpu.memory_space<vmem>>, vector<1x32xf32>
    %cst_19 = arith.constant 0.000000e+00 : f32
    %21 = vector.broadcast %cst_19 : f32 to vector<8x32xf32>
    %22 = vector.extract_strided_slice %18 {offsets = [0, 0], sizes = [8, 96], strides = [1, 1]} : vector<64x96xf32> to vector<8x96xf32>
    %cst_20 = arith.constant dense<0.000000e+00> : vector<8x96xf32>
    %23 = tpu.matmul %21, %19, %cst_20 {dimension_numbers = #tpu.dot_dimension_numbers<[1], [0], [0], [1], [0, 0, 1, 1], [], []>} : vector<8x32xf32>, vector<32x96xf32>, vector<8x96xf32> -> vector<8x96xf32>
    %24 = vector.extract_strided_slice %22 {offsets = [0, 0], sizes = [8, 32], strides = [1, 1]} : vector<8x96xf32> to vector<8x32xf32>
    %25 = vector.extract_strided_slice %23 {offsets = [0, 0], sizes = [8, 32], strides = [1, 1]} : vector<8x96xf32> to vector<8x32xf32>
    %26 = arith.addf %24, %25 : vector<8x32xf32>
    %27 = arith.negf %26 : vector<8x32xf32>
    %28 = math.exp %27 : vector<8x32xf32>
    %cst_21 = arith.constant 1.000000e+00 : f32
    %29 = vector.broadcast %cst_21 : f32 to vector<8x32xf32>
    %30 = arith.addf %29, %28 : vector<8x32xf32>
    %31 = arith.divf %29, %30 : vector<8x32xf32>
    %32 = vector.extract_strided_slice %22 {offsets = [0, 32], sizes = [8, 32], strides = [1, 1]} : vector<8x96xf32> to vector<8x32xf32>
    %33 = vector.extract_strided_slice %23 {offsets = [0, 32], sizes = [8, 32], strides = [1, 1]} : vector<8x96xf32> to vector<8x32xf32>
    %34 = arith.addf %32, %33 : vector<8x32xf32>
    %35 = arith.negf %34 : vector<8x32xf32>
    %36 = math.exp %35 : vector<8x32xf32>
    %cst_22 = arith.constant 1.000000e+00 : f32
    %37 = vector.broadcast %cst_22 : f32 to vector<8x32xf32>
    %38 = arith.addf %37, %36 : vector<8x32xf32>
    %39 = arith.divf %37, %38 : vector<8x32xf32>
    %40 = vector.extract_strided_slice %22 {offsets = [0, 64], sizes = [8, 32], strides = [1, 1]} : vector<8x96xf32> to vector<8x32xf32>
    %41 = vector.extract_strided_slice %23 {offsets = [0, 64], sizes = [8, 32], strides = [1, 1]} : vector<8x96xf32> to vector<8x32xf32>
    %42 = vector.broadcast %20 : vector<1x32xf32> to vector<8x32xf32>
    %43 = arith.addf %41, %42 : vector<8x32xf32>
    %44 = arith.mulf %31, %43 : vector<8x32xf32>
    %45 = arith.addf %40, %44 : vector<8x32xf32>
    %46 = math.tanh %45 : vector<8x32xf32>
    %cst_23 = arith.constant 1.000000e+00 : f32
    %47 = vector.broadcast %cst_23 : f32 to vector<8x32xf32>
    %48 = arith.subf %47, %39 : vector<8x32xf32>
    %49 = arith.mulf %48, %46 : vector<8x32xf32>
    %50 = arith.mulf %39, %21 : vector<8x32xf32>
    %51 = arith.addf %49, %50 : vector<8x32xf32>
    %52 = vector.extract_strided_slice %18 {offsets = [8, 0], sizes = [8, 96], strides = [1, 1]} : vector<64x96xf32> to vector<8x96xf32>
    %cst_24 = arith.constant dense<0.000000e+00> : vector<8x96xf32>
    %53 = tpu.matmul %51, %19, %cst_24 {dimension_numbers = #tpu.dot_dimension_numbers<[1], [0], [0], [1], [0, 0, 1, 1], [], []>} : vector<8x32xf32>, vector<32x96xf32>, vector<8x96xf32> -> vector<8x96xf32>
    %54 = vector.extract_strided_slice %52 {offsets = [0, 0], sizes = [8, 32], strides = [1, 1]} : vector<8x96xf32> to vector<8x32xf32>
    %55 = vector.extract_strided_slice %53 {offsets = [0, 0], sizes = [8, 32], strides = [1, 1]} : vector<8x96xf32> to vector<8x32xf32>
    %56 = arith.addf %54, %55 : vector<8x32xf32>
    %57 = arith.negf %56 : vector<8x32xf32>
    %58 = math.exp %57 : vector<8x32xf32>
    %cst_25 = arith.constant 1.000000e+00 : f32
    %59 = vector.broadcast %cst_25 : f32 to vector<8x32xf32>
    %60 = arith.addf %59, %58 : vector<8x32xf32>
    %61 = arith.divf %59, %60 : vector<8x32xf32>
    %62 = vector.extract_strided_slice %52 {offsets = [0, 32], sizes = [8, 32], strides = [1, 1]} : vector<8x96xf32> to vector<8x32xf32>
    %63 = vector.extract_strided_slice %53 {offsets = [0, 32], sizes = [8, 32], strides = [1, 1]} : vector<8x96xf32> to vector<8x32xf32>
    %64 = arith.addf %62, %63 : vector<8x32xf32>
    %65 = arith.negf %64 : vector<8x32xf32>
    %66 = math.exp %65 : vector<8x32xf32>
    %cst_26 = arith.constant 1.000000e+00 : f32
    %67 = vector.broadcast %cst_26 : f32 to vector<8x32xf32>
    %68 = arith.addf %67, %66 : vector<8x32xf32>
    %69 = arith.divf %67, %68 : vector<8x32xf32>
    %70 = vector.extract_strided_slice %52 {offsets = [0, 64], sizes = [8, 32], strides = [1, 1]} : vector<8x96xf32> to vector<8x32xf32>
    %71 = vector.extract_strided_slice %53 {offsets = [0, 64], sizes = [8, 32], strides = [1, 1]} : vector<8x96xf32> to vector<8x32xf32>
    %72 = vector.broadcast %20 : vector<1x32xf32> to vector<8x32xf32>
    %73 = arith.addf %71, %72 : vector<8x32xf32>
    %74 = arith.mulf %61, %73 : vector<8x32xf32>
    %75 = arith.addf %70, %74 : vector<8x32xf32>
    %76 = math.tanh %75 : vector<8x32xf32>
    %cst_27 = arith.constant 1.000000e+00 : f32
    %77 = vector.broadcast %cst_27 : f32 to vector<8x32xf32>
    %78 = arith.subf %77, %69 : vector<8x32xf32>
    %79 = arith.mulf %78, %76 : vector<8x32xf32>
    %80 = arith.mulf %69, %51 : vector<8x32xf32>
    %81 = arith.addf %79, %80 : vector<8x32xf32>
    %82 = vector.extract_strided_slice %18 {offsets = [16, 0], sizes = [8, 96], strides = [1, 1]} : vector<64x96xf32> to vector<8x96xf32>
    %cst_28 = arith.constant dense<0.000000e+00> : vector<8x96xf32>
    %83 = tpu.matmul %81, %19, %cst_28 {dimension_numbers = #tpu.dot_dimension_numbers<[1], [0], [0], [1], [0, 0, 1, 1], [], []>} : vector<8x32xf32>, vector<32x96xf32>, vector<8x96xf32> -> vector<8x96xf32>
    %84 = vector.extract_strided_slice %82 {offsets = [0, 0], sizes = [8, 32], strides = [1, 1]} : vector<8x96xf32> to vector<8x32xf32>
    %85 = vector.extract_strided_slice %83 {offsets = [0, 0], sizes = [8, 32], strides = [1, 1]} : vector<8x96xf32> to vector<8x32xf32>
    %86 = arith.addf %84, %85 : vector<8x32xf32>
    %87 = arith.negf %86 : vector<8x32xf32>
    %88 = math.exp %87 : vector<8x32xf32>
    %cst_29 = arith.constant 1.000000e+00 : f32
    %89 = vector.broadcast %cst_29 : f32 to vector<8x32xf32>
    %90 = arith.addf %89, %88 : vector<8x32xf32>
    %91 = arith.divf %89, %90 : vector<8x32xf32>
    %92 = vector.extract_strided_slice %82 {offsets = [0, 32], sizes = [8, 32], strides = [1, 1]} : vector<8x96xf32> to vector<8x32xf32>
    %93 = vector.extract_strided_slice %83 {offsets = [0, 32], sizes = [8, 32], strides = [1, 1]} : vector<8x96xf32> to vector<8x32xf32>
    %94 = arith.addf %92, %93 : vector<8x32xf32>
    %95 = arith.negf %94 : vector<8x32xf32>
    %96 = math.exp %95 : vector<8x32xf32>
    %cst_30 = arith.constant 1.000000e+00 : f32
    %97 = vector.broadcast %cst_30 : f32 to vector<8x32xf32>
    %98 = arith.addf %97, %96 : vector<8x32xf32>
    %99 = arith.divf %97, %98 : vector<8x32xf32>
    %100 = vector.extract_strided_slice %82 {offsets = [0, 64], sizes = [8, 32], strides = [1, 1]} : vector<8x96xf32> to vector<8x32xf32>
    %101 = vector.extract_strided_slice %83 {offsets = [0, 64], sizes = [8, 32], strides = [1, 1]} : vector<8x96xf32> to vector<8x32xf32>
    %102 = vector.broadcast %20 : vector<1x32xf32> to vector<8x32xf32>
    %103 = arith.addf %101, %102 : vector<8x32xf32>
    %104 = arith.mulf %91, %103 : vector<8x32xf32>
    %105 = arith.addf %100, %104 : vector<8x32xf32>
    %106 = math.tanh %105 : vector<8x32xf32>
    %cst_31 = arith.constant 1.000000e+00 : f32
    %107 = vector.broadcast %cst_31 : f32 to vector<8x32xf32>
    %108 = arith.subf %107, %99 : vector<8x32xf32>
    %109 = arith.mulf %108, %106 : vector<8x32xf32>
    %110 = arith.mulf %99, %81 : vector<8x32xf32>
    %111 = arith.addf %109, %110 : vector<8x32xf32>
    %112 = vector.extract_strided_slice %18 {offsets = [24, 0], sizes = [8, 96], strides = [1, 1]} : vector<64x96xf32> to vector<8x96xf32>
    %cst_32 = arith.constant dense<0.000000e+00> : vector<8x96xf32>
    %113 = tpu.matmul %111, %19, %cst_32 {dimension_numbers = #tpu.dot_dimension_numbers<[1], [0], [0], [1], [0, 0, 1, 1], [], []>} : vector<8x32xf32>, vector<32x96xf32>, vector<8x96xf32> -> vector<8x96xf32>
    %114 = vector.extract_strided_slice %112 {offsets = [0, 0], sizes = [8, 32], strides = [1, 1]} : vector<8x96xf32> to vector<8x32xf32>
    %115 = vector.extract_strided_slice %113 {offsets = [0, 0], sizes = [8, 32], strides = [1, 1]} : vector<8x96xf32> to vector<8x32xf32>
    %116 = arith.addf %114, %115 : vector<8x32xf32>
    %117 = arith.negf %116 : vector<8x32xf32>
    %118 = math.exp %117 : vector<8x32xf32>
    %cst_33 = arith.constant 1.000000e+00 : f32
    %119 = vector.broadcast %cst_33 : f32 to vector<8x32xf32>
    %120 = arith.addf %119, %118 : vector<8x32xf32>
    %121 = arith.divf %119, %120 : vector<8x32xf32>
    %122 = vector.extract_strided_slice %112 {offsets = [0, 32], sizes = [8, 32], strides = [1, 1]} : vector<8x96xf32> to vector<8x32xf32>
    %123 = vector.extract_strided_slice %113 {offsets = [0, 32], sizes = [8, 32], strides = [1, 1]} : vector<8x96xf32> to vector<8x32xf32>
    %124 = arith.addf %122, %123 : vector<8x32xf32>
    %125 = arith.negf %124 : vector<8x32xf32>
    %126 = math.exp %125 : vector<8x32xf32>
    %cst_34 = arith.constant 1.000000e+00 : f32
    %127 = vector.broadcast %cst_34 : f32 to vector<8x32xf32>
    %128 = arith.addf %127, %126 : vector<8x32xf32>
    %129 = arith.divf %127, %128 : vector<8x32xf32>
    %130 = vector.extract_strided_slice %112 {offsets = [0, 64], sizes = [8, 32], strides = [1, 1]} : vector<8x96xf32> to vector<8x32xf32>
    %131 = vector.extract_strided_slice %113 {offsets = [0, 64], sizes = [8, 32], strides = [1, 1]} : vector<8x96xf32> to vector<8x32xf32>
    %132 = vector.broadcast %20 : vector<1x32xf32> to vector<8x32xf32>
    %133 = arith.addf %131, %132 : vector<8x32xf32>
    %134 = arith.mulf %121, %133 : vector<8x32xf32>
    %135 = arith.addf %130, %134 : vector<8x32xf32>
    %136 = math.tanh %135 : vector<8x32xf32>
    %cst_35 = arith.constant 1.000000e+00 : f32
    %137 = vector.broadcast %cst_35 : f32 to vector<8x32xf32>
    %138 = arith.subf %137, %129 : vector<8x32xf32>
    %139 = arith.mulf %138, %136 : vector<8x32xf32>
    %140 = arith.mulf %129, %111 : vector<8x32xf32>
    %141 = arith.addf %139, %140 : vector<8x32xf32>
    %142 = vector.extract_strided_slice %18 {offsets = [32, 0], sizes = [8, 96], strides = [1, 1]} : vector<64x96xf32> to vector<8x96xf32>
    %cst_36 = arith.constant dense<0.000000e+00> : vector<8x96xf32>
    %143 = tpu.matmul %141, %19, %cst_36 {dimension_numbers = #tpu.dot_dimension_numbers<[1], [0], [0], [1], [0, 0, 1, 1], [], []>} : vector<8x32xf32>, vector<32x96xf32>, vector<8x96xf32> -> vector<8x96xf32>
    %144 = vector.extract_strided_slice %142 {offsets = [0, 0], sizes = [8, 32], strides = [1, 1]} : vector<8x96xf32> to vector<8x32xf32>
    %145 = vector.extract_strided_slice %143 {offsets = [0, 0], sizes = [8, 32], strides = [1, 1]} : vector<8x96xf32> to vector<8x32xf32>
    %146 = arith.addf %144, %145 : vector<8x32xf32>
    %147 = arith.negf %146 : vector<8x32xf32>
    %148 = math.exp %147 : vector<8x32xf32>
    %cst_37 = arith.constant 1.000000e+00 : f32
    %149 = vector.broadcast %cst_37 : f32 to vector<8x32xf32>
    %150 = arith.addf %149, %148 : vector<8x32xf32>
    %151 = arith.divf %149, %150 : vector<8x32xf32>
    %152 = vector.extract_strided_slice %142 {offsets = [0, 32], sizes = [8, 32], strides = [1, 1]} : vector<8x96xf32> to vector<8x32xf32>
    %153 = vector.extract_strided_slice %143 {offsets = [0, 32], sizes = [8, 32], strides = [1, 1]} : vector<8x96xf32> to vector<8x32xf32>
    %154 = arith.addf %152, %153 : vector<8x32xf32>
    %155 = arith.negf %154 : vector<8x32xf32>
    %156 = math.exp %155 : vector<8x32xf32>
    %cst_38 = arith.constant 1.000000e+00 : f32
    %157 = vector.broadcast %cst_38 : f32 to vector<8x32xf32>
    %158 = arith.addf %157, %156 : vector<8x32xf32>
    %159 = arith.divf %157, %158 : vector<8x32xf32>
    %160 = vector.extract_strided_slice %142 {offsets = [0, 64], sizes = [8, 32], strides = [1, 1]} : vector<8x96xf32> to vector<8x32xf32>
    %161 = vector.extract_strided_slice %143 {offsets = [0, 64], sizes = [8, 32], strides = [1, 1]} : vector<8x96xf32> to vector<8x32xf32>
    %162 = vector.broadcast %20 : vector<1x32xf32> to vector<8x32xf32>
    %163 = arith.addf %161, %162 : vector<8x32xf32>
    %164 = arith.mulf %151, %163 : vector<8x32xf32>
    %165 = arith.addf %160, %164 : vector<8x32xf32>
    %166 = math.tanh %165 : vector<8x32xf32>
    %cst_39 = arith.constant 1.000000e+00 : f32
    %167 = vector.broadcast %cst_39 : f32 to vector<8x32xf32>
    %168 = arith.subf %167, %159 : vector<8x32xf32>
    %169 = arith.mulf %168, %166 : vector<8x32xf32>
    %170 = arith.mulf %159, %141 : vector<8x32xf32>
    %171 = arith.addf %169, %170 : vector<8x32xf32>
    %172 = vector.extract_strided_slice %18 {offsets = [40, 0], sizes = [8, 96], strides = [1, 1]} : vector<64x96xf32> to vector<8x96xf32>
    %cst_40 = arith.constant dense<0.000000e+00> : vector<8x96xf32>
    %173 = tpu.matmul %171, %19, %cst_40 {dimension_numbers = #tpu.dot_dimension_numbers<[1], [0], [0], [1], [0, 0, 1, 1], [], []>} : vector<8x32xf32>, vector<32x96xf32>, vector<8x96xf32> -> vector<8x96xf32>
    %174 = vector.extract_strided_slice %172 {offsets = [0, 0], sizes = [8, 32], strides = [1, 1]} : vector<8x96xf32> to vector<8x32xf32>
    %175 = vector.extract_strided_slice %173 {offsets = [0, 0], sizes = [8, 32], strides = [1, 1]} : vector<8x96xf32> to vector<8x32xf32>
    %176 = arith.addf %174, %175 : vector<8x32xf32>
    %177 = arith.negf %176 : vector<8x32xf32>
    %178 = math.exp %177 : vector<8x32xf32>
    %cst_41 = arith.constant 1.000000e+00 : f32
    %179 = vector.broadcast %cst_41 : f32 to vector<8x32xf32>
    %180 = arith.addf %179, %178 : vector<8x32xf32>
    %181 = arith.divf %179, %180 : vector<8x32xf32>
    %182 = vector.extract_strided_slice %172 {offsets = [0, 32], sizes = [8, 32], strides = [1, 1]} : vector<8x96xf32> to vector<8x32xf32>
    %183 = vector.extract_strided_slice %173 {offsets = [0, 32], sizes = [8, 32], strides = [1, 1]} : vector<8x96xf32> to vector<8x32xf32>
    %184 = arith.addf %182, %183 : vector<8x32xf32>
    %185 = arith.negf %184 : vector<8x32xf32>
    %186 = math.exp %185 : vector<8x32xf32>
    %cst_42 = arith.constant 1.000000e+00 : f32
    %187 = vector.broadcast %cst_42 : f32 to vector<8x32xf32>
    %188 = arith.addf %187, %186 : vector<8x32xf32>
    %189 = arith.divf %187, %188 : vector<8x32xf32>
    %190 = vector.extract_strided_slice %172 {offsets = [0, 64], sizes = [8, 32], strides = [1, 1]} : vector<8x96xf32> to vector<8x32xf32>
    %191 = vector.extract_strided_slice %173 {offsets = [0, 64], sizes = [8, 32], strides = [1, 1]} : vector<8x96xf32> to vector<8x32xf32>
    %192 = vector.broadcast %20 : vector<1x32xf32> to vector<8x32xf32>
    %193 = arith.addf %191, %192 : vector<8x32xf32>
    %194 = arith.mulf %181, %193 : vector<8x32xf32>
    %195 = arith.addf %190, %194 : vector<8x32xf32>
    %196 = math.tanh %195 : vector<8x32xf32>
    %cst_43 = arith.constant 1.000000e+00 : f32
    %197 = vector.broadcast %cst_43 : f32 to vector<8x32xf32>
    %198 = arith.subf %197, %189 : vector<8x32xf32>
    %199 = arith.mulf %198, %196 : vector<8x32xf32>
    %200 = arith.mulf %189, %171 : vector<8x32xf32>
    %201 = arith.addf %199, %200 : vector<8x32xf32>
    %202 = vector.extract_strided_slice %18 {offsets = [48, 0], sizes = [8, 96], strides = [1, 1]} : vector<64x96xf32> to vector<8x96xf32>
    %cst_44 = arith.constant dense<0.000000e+00> : vector<8x96xf32>
    %203 = tpu.matmul %201, %19, %cst_44 {dimension_numbers = #tpu.dot_dimension_numbers<[1], [0], [0], [1], [0, 0, 1, 1], [], []>} : vector<8x32xf32>, vector<32x96xf32>, vector<8x96xf32> -> vector<8x96xf32>
    %204 = vector.extract_strided_slice %202 {offsets = [0, 0], sizes = [8, 32], strides = [1, 1]} : vector<8x96xf32> to vector<8x32xf32>
    %205 = vector.extract_strided_slice %203 {offsets = [0, 0], sizes = [8, 32], strides = [1, 1]} : vector<8x96xf32> to vector<8x32xf32>
    %206 = arith.addf %204, %205 : vector<8x32xf32>
    %207 = arith.negf %206 : vector<8x32xf32>
    %208 = math.exp %207 : vector<8x32xf32>
    %cst_45 = arith.constant 1.000000e+00 : f32
    %209 = vector.broadcast %cst_45 : f32 to vector<8x32xf32>
    %210 = arith.addf %209, %208 : vector<8x32xf32>
    %211 = arith.divf %209, %210 : vector<8x32xf32>
    %212 = vector.extract_strided_slice %202 {offsets = [0, 32], sizes = [8, 32], strides = [1, 1]} : vector<8x96xf32> to vector<8x32xf32>
    %213 = vector.extract_strided_slice %203 {offsets = [0, 32], sizes = [8, 32], strides = [1, 1]} : vector<8x96xf32> to vector<8x32xf32>
    %214 = arith.addf %212, %213 : vector<8x32xf32>
    %215 = arith.negf %214 : vector<8x32xf32>
    %216 = math.exp %215 : vector<8x32xf32>
    %cst_46 = arith.constant 1.000000e+00 : f32
    %217 = vector.broadcast %cst_46 : f32 to vector<8x32xf32>
    %218 = arith.addf %217, %216 : vector<8x32xf32>
    %219 = arith.divf %217, %218 : vector<8x32xf32>
    %220 = vector.extract_strided_slice %202 {offsets = [0, 64], sizes = [8, 32], strides = [1, 1]} : vector<8x96xf32> to vector<8x32xf32>
    %221 = vector.extract_strided_slice %203 {offsets = [0, 64], sizes = [8, 32], strides = [1, 1]} : vector<8x96xf32> to vector<8x32xf32>
    %222 = vector.broadcast %20 : vector<1x32xf32> to vector<8x32xf32>
    %223 = arith.addf %221, %222 : vector<8x32xf32>
    %224 = arith.mulf %211, %223 : vector<8x32xf32>
    %225 = arith.addf %220, %224 : vector<8x32xf32>
    %226 = math.tanh %225 : vector<8x32xf32>
    %cst_47 = arith.constant 1.000000e+00 : f32
    %227 = vector.broadcast %cst_47 : f32 to vector<8x32xf32>
    %228 = arith.subf %227, %219 : vector<8x32xf32>
    %229 = arith.mulf %228, %226 : vector<8x32xf32>
    %230 = arith.mulf %219, %201 : vector<8x32xf32>
    %231 = arith.addf %229, %230 : vector<8x32xf32>
    %232 = vector.extract_strided_slice %18 {offsets = [56, 0], sizes = [8, 96], strides = [1, 1]} : vector<64x96xf32> to vector<8x96xf32>
    %cst_48 = arith.constant dense<0.000000e+00> : vector<8x96xf32>
    %233 = tpu.matmul %231, %19, %cst_48 {dimension_numbers = #tpu.dot_dimension_numbers<[1], [0], [0], [1], [0, 0, 1, 1], [], []>} : vector<8x32xf32>, vector<32x96xf32>, vector<8x96xf32> -> vector<8x96xf32>
    %234 = vector.extract_strided_slice %232 {offsets = [0, 0], sizes = [8, 32], strides = [1, 1]} : vector<8x96xf32> to vector<8x32xf32>
    %235 = vector.extract_strided_slice %233 {offsets = [0, 0], sizes = [8, 32], strides = [1, 1]} : vector<8x96xf32> to vector<8x32xf32>
    %236 = arith.addf %234, %235 : vector<8x32xf32>
    %237 = arith.negf %236 : vector<8x32xf32>
    %238 = math.exp %237 : vector<8x32xf32>
    %cst_49 = arith.constant 1.000000e+00 : f32
    %239 = vector.broadcast %cst_49 : f32 to vector<8x32xf32>
    %240 = arith.addf %239, %238 : vector<8x32xf32>
    %241 = arith.divf %239, %240 : vector<8x32xf32>
    %242 = vector.extract_strided_slice %232 {offsets = [0, 32], sizes = [8, 32], strides = [1, 1]} : vector<8x96xf32> to vector<8x32xf32>
    %243 = vector.extract_strided_slice %233 {offsets = [0, 32], sizes = [8, 32], strides = [1, 1]} : vector<8x96xf32> to vector<8x32xf32>
    %244 = arith.addf %242, %243 : vector<8x32xf32>
    %245 = arith.negf %244 : vector<8x32xf32>
    %246 = math.exp %245 : vector<8x32xf32>
    %cst_50 = arith.constant 1.000000e+00 : f32
    %247 = vector.broadcast %cst_50 : f32 to vector<8x32xf32>
    %248 = arith.addf %247, %246 : vector<8x32xf32>
    %249 = arith.divf %247, %248 : vector<8x32xf32>
    %250 = vector.extract_strided_slice %232 {offsets = [0, 64], sizes = [8, 32], strides = [1, 1]} : vector<8x96xf32> to vector<8x32xf32>
    %251 = vector.extract_strided_slice %233 {offsets = [0, 64], sizes = [8, 32], strides = [1, 1]} : vector<8x96xf32> to vector<8x32xf32>
    %252 = vector.broadcast %20 : vector<1x32xf32> to vector<8x32xf32>
    %253 = arith.addf %251, %252 : vector<8x32xf32>
    %254 = arith.mulf %241, %253 : vector<8x32xf32>
    %255 = arith.addf %250, %254 : vector<8x32xf32>
    %256 = math.tanh %255 : vector<8x32xf32>
    %cst_51 = arith.constant 1.000000e+00 : f32
    %257 = vector.broadcast %cst_51 : f32 to vector<8x32xf32>
    %258 = arith.subf %257, %249 : vector<8x32xf32>
    %259 = arith.mulf %258, %256 : vector<8x32xf32>
    %260 = arith.mulf %249, %231 : vector<8x32xf32>
    %261 = arith.addf %259, %260 : vector<8x32xf32>
    %c0_52 = arith.constant 0 : index
    %c0_53 = arith.constant 0 : index
    %262 = vector.load %arg9[%c0_52, %c0_53] : memref<32x32xf32, #tpu.memory_space<vmem>>, vector<32x32xf32>
    %cst_54 = arith.constant dense<0.000000e+00> : vector<8x32xf32>
    %263 = tpu.matmul %261, %262, %cst_54 {dimension_numbers = #tpu.dot_dimension_numbers<[1], [0], [0], [1], [0, 0, 1, 1], [], []>} : vector<8x32xf32>, vector<32x32xf32>, vector<8x32xf32> -> vector<8x32xf32>
    %c0_55 = arith.constant 0 : index
    %c0_56 = arith.constant 0 : index
    %264 = vector.load %arg10[%c0_55, %c0_56] : memref<1x32xf32, #tpu.memory_space<vmem>>, vector<1x32xf32>
    %265 = vector.broadcast %264 : vector<1x32xf32> to vector<8x32xf32>
    %266 = arith.addf %263, %265 : vector<8x32xf32>
    %c0_57 = arith.constant 0 : index
    %c0_58 = arith.constant 0 : index
    %267 = vector.load %arg33[%c0_57, %c0_58] : memref<8x32xf32, #tpu.memory_space<vmem>>, vector<8x32xf32>
    tpu.vector_store %arg33[%c0_57, %c0_58], %266 {strides = array<i32>} : memref<8x32xf32, #tpu.memory_space<vmem>>, vector<8x32xf32>,
    %c0_59 = arith.constant 0 : index
    %c0_60 = arith.constant 0 : index
    %268 = vector.load %arg11[%c0_59, %c0_60] : memref<1x32xf32, #tpu.memory_space<vmem>>, vector<1x32xf32>
    %c0_61 = arith.constant 0 : index
    %c0_62 = arith.constant 0 : index
    %269 = vector.load %arg34[%c0_61, %c0_62] : memref<10x32xf32, #tpu.memory_space<vmem>>, vector<1x32xf32>
    tpu.vector_store %arg34[%c0_61, %c0_62], %268 {strides = array<i32>} : memref<10x32xf32, #tpu.memory_space<vmem>>, vector<1x32xf32>,
    %270 = vector.extract_strided_slice %266 {offsets = [0, 0], sizes = [4, 32], strides = [1, 1]} : vector<8x32xf32> to vector<4x32xf32>
    %c1 = arith.constant 1 : index
    %c0_63 = arith.constant 0 : index
    %271 = vector.load %arg34[%c1, %c0_63] : memref<10x32xf32, #tpu.memory_space<vmem>>, vector<4x32xf32>
    tpu.vector_store %arg34[%c1, %c0_63], %270 {strides = array<i32>} : memref<10x32xf32, #tpu.memory_space<vmem>>, vector<4x32xf32>,
    %c0_64 = arith.constant 0 : index
    %c0_65 = arith.constant 0 : index
    %272 = vector.load %arg11[%c0_64, %c0_65] : memref<1x32xf32, #tpu.memory_space<vmem>>, vector<1x32xf32>
    %c5 = arith.constant 5 : index
    %c0_66 = arith.constant 0 : index
    %273 = vector.load %arg34[%c5, %c0_66] : memref<10x32xf32, #tpu.memory_space<vmem>>, vector<1x32xf32>
    tpu.vector_store %arg34[%c5, %c0_66], %272 {strides = array<i32>} : memref<10x32xf32, #tpu.memory_space<vmem>>, vector<1x32xf32>,
    %274 = vector.extract_strided_slice %266 {offsets = [4, 0], sizes = [4, 32], strides = [1, 1]} : vector<8x32xf32> to vector<4x32xf32>
    %c6 = arith.constant 6 : index
    %c0_67 = arith.constant 0 : index
    %275 = vector.load %arg34[%c6, %c0_67] : memref<10x32xf32, #tpu.memory_space<vmem>>, vector<4x32xf32>
    tpu.vector_store %arg34[%c6, %c0_67], %274 {strides = array<i32>} : memref<10x32xf32, #tpu.memory_space<vmem>>, vector<4x32xf32>,
    %c0_68 = arith.constant 0 : index
    %c0_69 = arith.constant 0 : index
    %276 = vector.load %arg34[%c0_68, %c0_69] : memref<10x32xf32, #tpu.memory_space<vmem>>, vector<10x32xf32>
    %c0_70 = arith.constant 0 : index
    %c0_71 = arith.constant 0 : index
    %277 = vector.load %arg12[%c0_70, %c0_71] : memref<32x32xf32, #tpu.memory_space<vmem>>, vector<32x32xf32>
    %cst_72 = arith.constant dense<0.000000e+00> : vector<10x32xf32>
    %278 = tpu.matmul %276, %277, %cst_72 {dimension_numbers = #tpu.dot_dimension_numbers<[1], [0], [0], [1], [0, 0, 1, 1], [], []>} : vector<10x32xf32>, vector<32x32xf32>, vector<10x32xf32> -> vector<10x32xf32>
    %c0_73 = arith.constant 0 : index
    %c0_74 = arith.constant 0 : index
    %279 = vector.load %arg13[%c0_73, %c0_74] : memref<1x32xf32, #tpu.memory_space<vmem>>, vector<1x32xf32>
    %280 = vector.broadcast %279 : vector<1x32xf32> to vector<10x32xf32>
    %281 = arith.addf %278, %280 : vector<10x32xf32>
    %cst_75 = arith.constant 0.353553385 : f32
    %282 = vector.broadcast %cst_75 : f32 to vector<10x32xf32>
    %283 = arith.mulf %281, %282 : vector<10x32xf32>
    %c0_76 = arith.constant 0 : index
    %c0_77 = arith.constant 0 : index
    %284 = vector.load %arg14[%c0_76, %c0_77] : memref<32x32xf32, #tpu.memory_space<vmem>>, vector<32x32xf32>
    %cst_78 = arith.constant dense<0.000000e+00> : vector<10x32xf32>
    %285 = tpu.matmul %276, %284, %cst_78 {dimension_numbers = #tpu.dot_dimension_numbers<[1], [0], [0], [1], [0, 0, 1, 1], [], []>} : vector<10x32xf32>, vector<32x32xf32>, vector<10x32xf32> -> vector<10x32xf32>
    %c0_79 = arith.constant 0 : index
    %c0_80 = arith.constant 0 : index
    %286 = vector.load %arg15[%c0_79, %c0_80] : memref<1x32xf32, #tpu.memory_space<vmem>>, vector<1x32xf32>
    %287 = vector.broadcast %286 : vector<1x32xf32> to vector<10x32xf32>
    %288 = arith.addf %285, %287 : vector<10x32xf32>
    %c0_81 = arith.constant 0 : index
    %c0_82 = arith.constant 0 : index
    %289 = vector.load %arg16[%c0_81, %c0_82] : memref<32x32xf32, #tpu.memory_space<vmem>>, vector<32x32xf32>
    %cst_83 = arith.constant dense<0.000000e+00> : vector<10x32xf32>
    %290 = tpu.matmul %276, %289, %cst_83 {dimension_numbers = #tpu.dot_dimension_numbers<[1], [0], [0], [1], [0, 0, 1, 1], [], []>} : vector<10x32xf32>, vector<32x32xf32>, vector<10x32xf32> -> vector<10x32xf32>
    %c0_84 = arith.constant 0 : index
    %c0_85 = arith.constant 0 : index
    %291 = vector.load %arg17[%c0_84, %c0_85] : memref<1x32xf32, #tpu.memory_space<vmem>>, vector<1x32xf32>
    %292 = vector.broadcast %291 : vector<1x32xf32> to vector<10x32xf32>
    %293 = arith.addf %290, %292 : vector<10x32xf32>
    %cst_86 = arith.constant 0.000000e+00 : f32
    %294 = vector.broadcast %cst_86 : f32 to vector<5x32xf32>
    %295 = vector.extract_strided_slice %283 {offsets = [0, 0], sizes = [5, 8], strides = [1, 1]} : vector<10x32xf32> to vector<5x8xf32>
    %296 = vector.extract_strided_slice %288 {offsets = [0, 0], sizes = [5, 8], strides = [1, 1]} : vector<10x32xf32> to vector<5x8xf32>
    %297 = vector.extract_strided_slice %293 {offsets = [0, 0], sizes = [5, 8], strides = [1, 1]} : vector<10x32xf32> to vector<5x8xf32>
    %cst_87 = arith.constant dense<0.000000e+00> : vector<5x5xf32>
    %298 = tpu.matmul %295, %296, %cst_87 {dimension_numbers = #tpu.dot_dimension_numbers<[1], [1], [0], [0], [0, 0, 1, 0], [], []>} : vector<5x8xf32>, vector<5x8xf32>, vector<5x5xf32> -> vector<5x5xf32>
    %cst_88 = arith.constant dense<0xFF800000> : vector<5xf32>
    %299 = vector.multi_reduction <maximumf>, %298, %cst_88 [1] : vector<5x5xf32> to vector<5xf32>
    %300 = vector.shape_cast %299 : vector<5xf32> to vector<5x1xf32>
    %301 = vector.broadcast %300 : vector<5x1xf32> to vector<5x5xf32>
    %302 = arith.subf %298, %301 : vector<5x5xf32>
    %303 = math.exp %302 : vector<5x5xf32>
    %cst_89 = arith.constant dense<0.000000e+00> : vector<5xf32>
    %304 = vector.multi_reduction <add>, %303, %cst_89 [1] : vector<5x5xf32> to vector<5xf32>
    %305 = vector.shape_cast %304 : vector<5xf32> to vector<5x1xf32>
    %306 = vector.broadcast %305 : vector<5x1xf32> to vector<5x5xf32>
    %307 = arith.divf %303, %306 : vector<5x5xf32>
    %cst_90 = arith.constant dense<0.000000e+00> : vector<5x8xf32>
    %308 = tpu.matmul %307, %297, %cst_90 {dimension_numbers = #tpu.dot_dimension_numbers<[1], [0], [0], [1], [0, 0, 1, 1], [], []>} : vector<5x5xf32>, vector<5x8xf32>, vector<5x8xf32> -> vector<5x8xf32>
    %c0_91 = arith.constant 0 : index
    %c0_92 = arith.constant 0 : index
    %309 = vector.load %arg18[%c0_91, %c0_92] : memref<32x32xf32, #tpu.memory_space<vmem>>, vector<8x32xf32>
    %cst_93 = arith.constant dense<0.000000e+00> : vector<5x32xf32>
    %310 = tpu.matmul %308, %309, %cst_93 {dimension_numbers = #tpu.dot_dimension_numbers<[1], [0], [0], [1], [0, 0, 1, 1], [], []>} : vector<5x8xf32>, vector<8x32xf32>, vector<5x32xf32> -> vector<5x32xf32>
    %311 = arith.addf %294, %310 : vector<5x32xf32>
    %312 = vector.extract_strided_slice %283 {offsets = [0, 8], sizes = [5, 8], strides = [1, 1]} : vector<10x32xf32> to vector<5x8xf32>
    %313 = vector.extract_strided_slice %288 {offsets = [0, 8], sizes = [5, 8], strides = [1, 1]} : vector<10x32xf32> to vector<5x8xf32>
    %314 = vector.extract_strided_slice %293 {offsets = [0, 8], sizes = [5, 8], strides = [1, 1]} : vector<10x32xf32> to vector<5x8xf32>
    %cst_94 = arith.constant dense<0.000000e+00> : vector<5x5xf32>
    %315 = tpu.matmul %312, %313, %cst_94 {dimension_numbers = #tpu.dot_dimension_numbers<[1], [1], [0], [0], [0, 0, 1, 0], [], []>} : vector<5x8xf32>, vector<5x8xf32>, vector<5x5xf32> -> vector<5x5xf32>
    %cst_95 = arith.constant dense<0xFF800000> : vector<5xf32>
    %316 = vector.multi_reduction <maximumf>, %315, %cst_95 [1] : vector<5x5xf32> to vector<5xf32>
    %317 = vector.shape_cast %316 : vector<5xf32> to vector<5x1xf32>
    %318 = vector.broadcast %317 : vector<5x1xf32> to vector<5x5xf32>
    %319 = arith.subf %315, %318 : vector<5x5xf32>
    %320 = math.exp %319 : vector<5x5xf32>
    %cst_96 = arith.constant dense<0.000000e+00> : vector<5xf32>
    %321 = vector.multi_reduction <add>, %320, %cst_96 [1] : vector<5x5xf32> to vector<5xf32>
    %322 = vector.shape_cast %321 : vector<5xf32> to vector<5x1xf32>
    %323 = vector.broadcast %322 : vector<5x1xf32> to vector<5x5xf32>
    %324 = arith.divf %320, %323 : vector<5x5xf32>
    %cst_97 = arith.constant dense<0.000000e+00> : vector<5x8xf32>
    %325 = tpu.matmul %324, %314, %cst_97 {dimension_numbers = #tpu.dot_dimension_numbers<[1], [0], [0], [1], [0, 0, 1, 1], [], []>} : vector<5x5xf32>, vector<5x8xf32>, vector<5x8xf32> -> vector<5x8xf32>
    %c8 = arith.constant 8 : index
    %c0_98 = arith.constant 0 : index
    %326 = vector.load %arg18[%c8, %c0_98] : memref<32x32xf32, #tpu.memory_space<vmem>>, vector<8x32xf32>
    %cst_99 = arith.constant dense<0.000000e+00> : vector<5x32xf32>
    %327 = tpu.matmul %325, %326, %cst_99 {dimension_numbers = #tpu.dot_dimension_numbers<[1], [0], [0], [1], [0, 0, 1, 1], [], []>} : vector<5x8xf32>, vector<8x32xf32>, vector<5x32xf32> -> vector<5x32xf32>
    %328 = arith.addf %311, %327 : vector<5x32xf32>
    %329 = vector.extract_strided_slice %283 {offsets = [0, 16], sizes = [5, 8], strides = [1, 1]} : vector<10x32xf32> to vector<5x8xf32>
    %330 = vector.extract_strided_slice %288 {offsets = [0, 16], sizes = [5, 8], strides = [1, 1]} : vector<10x32xf32> to vector<5x8xf32>
    %331 = vector.extract_strided_slice %293 {offsets = [0, 16], sizes = [5, 8], strides = [1, 1]} : vector<10x32xf32> to vector<5x8xf32>
    %cst_100 = arith.constant dense<0.000000e+00> : vector<5x5xf32>
    %332 = tpu.matmul %329, %330, %cst_100 {dimension_numbers = #tpu.dot_dimension_numbers<[1], [1], [0], [0], [0, 0, 1, 0], [], []>} : vector<5x8xf32>, vector<5x8xf32>, vector<5x5xf32> -> vector<5x5xf32>
    %cst_101 = arith.constant dense<0xFF800000> : vector<5xf32>
    %333 = vector.multi_reduction <maximumf>, %332, %cst_101 [1] : vector<5x5xf32> to vector<5xf32>
    %334 = vector.shape_cast %333 : vector<5xf32> to vector<5x1xf32>
    %335 = vector.broadcast %334 : vector<5x1xf32> to vector<5x5xf32>
    %336 = arith.subf %332, %335 : vector<5x5xf32>
    %337 = math.exp %336 : vector<5x5xf32>
    %cst_102 = arith.constant dense<0.000000e+00> : vector<5xf32>
    %338 = vector.multi_reduction <add>, %337, %cst_102 [1] : vector<5x5xf32> to vector<5xf32>
    %339 = vector.shape_cast %338 : vector<5xf32> to vector<5x1xf32>
    %340 = vector.broadcast %339 : vector<5x1xf32> to vector<5x5xf32>
    %341 = arith.divf %337, %340 : vector<5x5xf32>
    %cst_103 = arith.constant dense<0.000000e+00> : vector<5x8xf32>
    %342 = tpu.matmul %341, %331, %cst_103 {dimension_numbers = #tpu.dot_dimension_numbers<[1], [0], [0], [1], [0, 0, 1, 1], [], []>} : vector<5x5xf32>, vector<5x8xf32>, vector<5x8xf32> -> vector<5x8xf32>
    %c16 = arith.constant 16 : index
    %c0_104 = arith.constant 0 : index
    %343 = vector.load %arg18[%c16, %c0_104] : memref<32x32xf32, #tpu.memory_space<vmem>>, vector<8x32xf32>
    %cst_105 = arith.constant dense<0.000000e+00> : vector<5x32xf32>
    %344 = tpu.matmul %342, %343, %cst_105 {dimension_numbers = #tpu.dot_dimension_numbers<[1], [0], [0], [1], [0, 0, 1, 1], [], []>} : vector<5x8xf32>, vector<8x32xf32>, vector<5x32xf32> -> vector<5x32xf32>
    %345 = arith.addf %328, %344 : vector<5x32xf32>
    %346 = vector.extract_strided_slice %283 {offsets = [0, 24], sizes = [5, 8], strides = [1, 1]} : vector<10x32xf32> to vector<5x8xf32>
    %347 = vector.extract_strided_slice %288 {offsets = [0, 24], sizes = [5, 8], strides = [1, 1]} : vector<10x32xf32> to vector<5x8xf32>
    %348 = vector.extract_strided_slice %293 {offsets = [0, 24], sizes = [5, 8], strides = [1, 1]} : vector<10x32xf32> to vector<5x8xf32>
    %cst_106 = arith.constant dense<0.000000e+00> : vector<5x5xf32>
    %349 = tpu.matmul %346, %347, %cst_106 {dimension_numbers = #tpu.dot_dimension_numbers<[1], [1], [0], [0], [0, 0, 1, 0], [], []>} : vector<5x8xf32>, vector<5x8xf32>, vector<5x5xf32> -> vector<5x5xf32>
    %cst_107 = arith.constant dense<0xFF800000> : vector<5xf32>
    %350 = vector.multi_reduction <maximumf>, %349, %cst_107 [1] : vector<5x5xf32> to vector<5xf32>
    %351 = vector.shape_cast %350 : vector<5xf32> to vector<5x1xf32>
    %352 = vector.broadcast %351 : vector<5x1xf32> to vector<5x5xf32>
    %353 = arith.subf %349, %352 : vector<5x5xf32>
    %354 = math.exp %353 : vector<5x5xf32>
    %cst_108 = arith.constant dense<0.000000e+00> : vector<5xf32>
    %355 = vector.multi_reduction <add>, %354, %cst_108 [1] : vector<5x5xf32> to vector<5xf32>
    %356 = vector.shape_cast %355 : vector<5xf32> to vector<5x1xf32>
    %357 = vector.broadcast %356 : vector<5x1xf32> to vector<5x5xf32>
    %358 = arith.divf %354, %357 : vector<5x5xf32>
    %cst_109 = arith.constant dense<0.000000e+00> : vector<5x8xf32>
    %359 = tpu.matmul %358, %348, %cst_109 {dimension_numbers = #tpu.dot_dimension_numbers<[1], [0], [0], [1], [0, 0, 1, 1], [], []>} : vector<5x5xf32>, vector<5x8xf32>, vector<5x8xf32> -> vector<5x8xf32>
    %c24 = arith.constant 24 : index
    %c0_110 = arith.constant 0 : index
    %360 = vector.load %arg18[%c24, %c0_110] : memref<32x32xf32, #tpu.memory_space<vmem>>, vector<8x32xf32>
    %cst_111 = arith.constant dense<0.000000e+00> : vector<5x32xf32>
    %361 = tpu.matmul %359, %360, %cst_111 {dimension_numbers = #tpu.dot_dimension_numbers<[1], [0], [0], [1], [0, 0, 1, 1], [], []>} : vector<5x8xf32>, vector<8x32xf32>, vector<5x32xf32> -> vector<5x32xf32>
    %362 = arith.addf %345, %361 : vector<5x32xf32>
    %c0_112 = arith.constant 0 : index
    %c0_113 = arith.constant 0 : index
    %363 = vector.load %arg35[%c0_112, %c0_113] : memref<10x32xf32, #tpu.memory_space<vmem>>, vector<5x32xf32>
    tpu.vector_store %arg35[%c0_112, %c0_113], %362 {strides = array<i32>} : memref<10x32xf32, #tpu.memory_space<vmem>>, vector<5x32xf32>,
    %cst_114 = arith.constant 0.000000e+00 : f32
    %364 = vector.broadcast %cst_114 : f32 to vector<5x32xf32>
    %365 = vector.extract_strided_slice %283 {offsets = [5, 0], sizes = [5, 8], strides = [1, 1]} : vector<10x32xf32> to vector<5x8xf32>
    %366 = vector.extract_strided_slice %288 {offsets = [5, 0], sizes = [5, 8], strides = [1, 1]} : vector<10x32xf32> to vector<5x8xf32>
    %367 = vector.extract_strided_slice %293 {offsets = [5, 0], sizes = [5, 8], strides = [1, 1]} : vector<10x32xf32> to vector<5x8xf32>
    %cst_115 = arith.constant dense<0.000000e+00> : vector<5x5xf32>
    %368 = tpu.matmul %365, %366, %cst_115 {dimension_numbers = #tpu.dot_dimension_numbers<[1], [1], [0], [0], [0, 0, 1, 0], [], []>} : vector<5x8xf32>, vector<5x8xf32>, vector<5x5xf32> -> vector<5x5xf32>
    %cst_116 = arith.constant dense<0xFF800000> : vector<5xf32>
    %369 = vector.multi_reduction <maximumf>, %368, %cst_116 [1] : vector<5x5xf32> to vector<5xf32>
    %370 = vector.shape_cast %369 : vector<5xf32> to vector<5x1xf32>
    %371 = vector.broadcast %370 : vector<5x1xf32> to vector<5x5xf32>
    %372 = arith.subf %368, %371 : vector<5x5xf32>
    %373 = math.exp %372 : vector<5x5xf32>
    %cst_117 = arith.constant dense<0.000000e+00> : vector<5xf32>
    %374 = vector.multi_reduction <add>, %373, %cst_117 [1] : vector<5x5xf32> to vector<5xf32>
    %375 = vector.shape_cast %374 : vector<5xf32> to vector<5x1xf32>
    %376 = vector.broadcast %375 : vector<5x1xf32> to vector<5x5xf32>
    %377 = arith.divf %373, %376 : vector<5x5xf32>
    %cst_118 = arith.constant dense<0.000000e+00> : vector<5x8xf32>
    %378 = tpu.matmul %377, %367, %cst_118 {dimension_numbers = #tpu.dot_dimension_numbers<[1], [0], [0], [1], [0, 0, 1, 1], [], []>} : vector<5x5xf32>, vector<5x8xf32>, vector<5x8xf32> -> vector<5x8xf32>
    %c0_119 = arith.constant 0 : index
    %c0_120 = arith.constant 0 : index
    %379 = vector.load %arg18[%c0_119, %c0_120] : memref<32x32xf32, #tpu.memory_space<vmem>>, vector<8x32xf32>
    %cst_121 = arith.constant dense<0.000000e+00> : vector<5x32xf32>
    %380 = tpu.matmul %378, %379, %cst_121 {dimension_numbers = #tpu.dot_dimension_numbers<[1], [0], [0], [1], [0, 0, 1, 1], [], []>} : vector<5x8xf32>, vector<8x32xf32>, vector<5x32xf32> -> vector<5x32xf32>
    %381 = arith.addf %364, %380 : vector<5x32xf32>
    %382 = vector.extract_strided_slice %283 {offsets = [5, 8], sizes = [5, 8], strides = [1, 1]} : vector<10x32xf32> to vector<5x8xf32>
    %383 = vector.extract_strided_slice %288 {offsets = [5, 8], sizes = [5, 8], strides = [1, 1]} : vector<10x32xf32> to vector<5x8xf32>
    %384 = vector.extract_strided_slice %293 {offsets = [5, 8], sizes = [5, 8], strides = [1, 1]} : vector<10x32xf32> to vector<5x8xf32>
    %cst_122 = arith.constant dense<0.000000e+00> : vector<5x5xf32>
    %385 = tpu.matmul %382, %383, %cst_122 {dimension_numbers = #tpu.dot_dimension_numbers<[1], [1], [0], [0], [0, 0, 1, 0], [], []>} : vector<5x8xf32>, vector<5x8xf32>, vector<5x5xf32> -> vector<5x5xf32>
    %cst_123 = arith.constant dense<0xFF800000> : vector<5xf32>
    %386 = vector.multi_reduction <maximumf>, %385, %cst_123 [1] : vector<5x5xf32> to vector<5xf32>
    %387 = vector.shape_cast %386 : vector<5xf32> to vector<5x1xf32>
    %388 = vector.broadcast %387 : vector<5x1xf32> to vector<5x5xf32>
    %389 = arith.subf %385, %388 : vector<5x5xf32>
    %390 = math.exp %389 : vector<5x5xf32>
    %cst_124 = arith.constant dense<0.000000e+00> : vector<5xf32>
    %391 = vector.multi_reduction <add>, %390, %cst_124 [1] : vector<5x5xf32> to vector<5xf32>
    %392 = vector.shape_cast %391 : vector<5xf32> to vector<5x1xf32>
    %393 = vector.broadcast %392 : vector<5x1xf32> to vector<5x5xf32>
    %394 = arith.divf %390, %393 : vector<5x5xf32>
    %cst_125 = arith.constant dense<0.000000e+00> : vector<5x8xf32>
    %395 = tpu.matmul %394, %384, %cst_125 {dimension_numbers = #tpu.dot_dimension_numbers<[1], [0], [0], [1], [0, 0, 1, 1], [], []>} : vector<5x5xf32>, vector<5x8xf32>, vector<5x8xf32> -> vector<5x8xf32>
    %c8_126 = arith.constant 8 : index
    %c0_127 = arith.constant 0 : index
    %396 = vector.load %arg18[%c8_126, %c0_127] : memref<32x32xf32, #tpu.memory_space<vmem>>, vector<8x32xf32>
    %cst_128 = arith.constant dense<0.000000e+00> : vector<5x32xf32>
    %397 = tpu.matmul %395, %396, %cst_128 {dimension_numbers = #tpu.dot_dimension_numbers<[1], [0], [0], [1], [0, 0, 1, 1], [], []>} : vector<5x8xf32>, vector<8x32xf32>, vector<5x32xf32> -> vector<5x32xf32>
    %398 = arith.addf %381, %397 : vector<5x32xf32>
    %399 = vector.extract_strided_slice %283 {offsets = [5, 16], sizes = [5, 8], strides = [1, 1]} : vector<10x32xf32> to vector<5x8xf32>
    %400 = vector.extract_strided_slice %288 {offsets = [5, 16], sizes = [5, 8], strides = [1, 1]} : vector<10x32xf32> to vector<5x8xf32>
    %401 = vector.extract_strided_slice %293 {offsets = [5, 16], sizes = [5, 8], strides = [1, 1]} : vector<10x32xf32> to vector<5x8xf32>
    %cst_129 = arith.constant dense<0.000000e+00> : vector<5x5xf32>
    %402 = tpu.matmul %399, %400, %cst_129 {dimension_numbers = #tpu.dot_dimension_numbers<[1], [1], [0], [0], [0, 0, 1, 0], [], []>} : vector<5x8xf32>, vector<5x8xf32>, vector<5x5xf32> -> vector<5x5xf32>
    %cst_130 = arith.constant dense<0xFF800000> : vector<5xf32>
    %403 = vector.multi_reduction <maximumf>, %402, %cst_130 [1] : vector<5x5xf32> to vector<5xf32>
    %404 = vector.shape_cast %403 : vector<5xf32> to vector<5x1xf32>
    %405 = vector.broadcast %404 : vector<5x1xf32> to vector<5x5xf32>
    %406 = arith.subf %402, %405 : vector<5x5xf32>
    %407 = math.exp %406 : vector<5x5xf32>
    %cst_131 = arith.constant dense<0.000000e+00> : vector<5xf32>
    %408 = vector.multi_reduction <add>, %407, %cst_131 [1] : vector<5x5xf32> to vector<5xf32>
    %409 = vector.shape_cast %408 : vector<5xf32> to vector<5x1xf32>
    %410 = vector.broadcast %409 : vector<5x1xf32> to vector<5x5xf32>
    %411 = arith.divf %407, %410 : vector<5x5xf32>
    %cst_132 = arith.constant dense<0.000000e+00> : vector<5x8xf32>
    %412 = tpu.matmul %411, %401, %cst_132 {dimension_numbers = #tpu.dot_dimension_numbers<[1], [0], [0], [1], [0, 0, 1, 1], [], []>} : vector<5x5xf32>, vector<5x8xf32>, vector<5x8xf32> -> vector<5x8xf32>
    %c16_133 = arith.constant 16 : index
    %c0_134 = arith.constant 0 : index
    %413 = vector.load %arg18[%c16_133, %c0_134] : memref<32x32xf32, #tpu.memory_space<vmem>>, vector<8x32xf32>
    %cst_135 = arith.constant dense<0.000000e+00> : vector<5x32xf32>
    %414 = tpu.matmul %412, %413, %cst_135 {dimension_numbers = #tpu.dot_dimension_numbers<[1], [0], [0], [1], [0, 0, 1, 1], [], []>} : vector<5x8xf32>, vector<8x32xf32>, vector<5x32xf32> -> vector<5x32xf32>
    %415 = arith.addf %398, %414 : vector<5x32xf32>
    %416 = vector.extract_strided_slice %283 {offsets = [5, 24], sizes = [5, 8], strides = [1, 1]} : vector<10x32xf32> to vector<5x8xf32>
    %417 = vector.extract_strided_slice %288 {offsets = [5, 24], sizes = [5, 8], strides = [1, 1]} : vector<10x32xf32> to vector<5x8xf32>
    %418 = vector.extract_strided_slice %293 {offsets = [5, 24], sizes = [5, 8], strides = [1, 1]} : vector<10x32xf32> to vector<5x8xf32>
    %cst_136 = arith.constant dense<0.000000e+00> : vector<5x5xf32>
    %419 = tpu.matmul %416, %417, %cst_136 {dimension_numbers = #tpu.dot_dimension_numbers<[1], [1], [0], [0], [0, 0, 1, 0], [], []>} : vector<5x8xf32>, vector<5x8xf32>, vector<5x5xf32> -> vector<5x5xf32>
    %cst_137 = arith.constant dense<0xFF800000> : vector<5xf32>
    %420 = vector.multi_reduction <maximumf>, %419, %cst_137 [1] : vector<5x5xf32> to vector<5xf32>
    %421 = vector.shape_cast %420 : vector<5xf32> to vector<5x1xf32>
    %422 = vector.broadcast %421 : vector<5x1xf32> to vector<5x5xf32>
    %423 = arith.subf %419, %422 : vector<5x5xf32>
    %424 = math.exp %423 : vector<5x5xf32>
    %cst_138 = arith.constant dense<0.000000e+00> : vector<5xf32>
    %425 = vector.multi_reduction <add>, %424, %cst_138 [1] : vector<5x5xf32> to vector<5xf32>
    %426 = vector.shape_cast %425 : vector<5xf32> to vector<5x1xf32>
    %427 = vector.broadcast %426 : vector<5x1xf32> to vector<5x5xf32>
    %428 = arith.divf %424, %427 : vector<5x5xf32>
    %cst_139 = arith.constant dense<0.000000e+00> : vector<5x8xf32>
    %429 = tpu.matmul %428, %418, %cst_139 {dimension_numbers = #tpu.dot_dimension_numbers<[1], [0], [0], [1], [0, 0, 1, 1], [], []>} : vector<5x5xf32>, vector<5x8xf32>, vector<5x8xf32> -> vector<5x8xf32>
    %c24_140 = arith.constant 24 : index
    %c0_141 = arith.constant 0 : index
    %430 = vector.load %arg18[%c24_140, %c0_141] : memref<32x32xf32, #tpu.memory_space<vmem>>, vector<8x32xf32>
    %cst_142 = arith.constant dense<0.000000e+00> : vector<5x32xf32>
    %431 = tpu.matmul %429, %430, %cst_142 {dimension_numbers = #tpu.dot_dimension_numbers<[1], [0], [0], [1], [0, 0, 1, 1], [], []>} : vector<5x8xf32>, vector<8x32xf32>, vector<5x32xf32> -> vector<5x32xf32>
    %432 = arith.addf %415, %431 : vector<5x32xf32>
    %c5_143 = arith.constant 5 : index
    %c0_144 = arith.constant 0 : index
    %433 = vector.load %arg35[%c5_143, %c0_144] : memref<10x32xf32, #tpu.memory_space<vmem>>, vector<5x32xf32>
    tpu.vector_store %arg35[%c5_143, %c0_144], %432 {strides = array<i32>} : memref<10x32xf32, #tpu.memory_space<vmem>>, vector<5x32xf32>,
    %c0_145 = arith.constant 0 : index
    %c0_146 = arith.constant 0 : index
    %434 = vector.load %arg35[%c0_145, %c0_146] : memref<10x32xf32, #tpu.memory_space<vmem>>, vector<10x32xf32>
    %c0_147 = arith.constant 0 : index
    %c0_148 = arith.constant 0 : index
    %435 = vector.load %arg19[%c0_147, %c0_148] : memref<1x32xf32, #tpu.memory_space<vmem>>, vector<1x32xf32>
    %436 = vector.broadcast %435 : vector<1x32xf32> to vector<10x32xf32>
    %437 = arith.addf %434, %436 : vector<10x32xf32>
    %438 = arith.addf %276, %437 : vector<10x32xf32>
    %c0_149 = arith.constant 0 : index
    %c0_150 = arith.constant 0 : index
    %439 = vector.load %arg20[%c0_149, %c0_150] : memref<1x32xf32, #tpu.memory_space<vmem>>, vector<1x32xf32>
    %c0_151 = arith.constant 0 : index
    %c0_152 = arith.constant 0 : index
    %440 = vector.load %arg21[%c0_151, %c0_152] : memref<1x32xf32, #tpu.memory_space<vmem>>, vector<1x32xf32>
    %cst_153 = arith.constant dense<0.000000e+00> : vector<10xf32>
    %441 = vector.multi_reduction <add>, %438, %cst_153 [1] : vector<10x32xf32> to vector<10xf32>
    %442 = vector.shape_cast %441 : vector<10xf32> to vector<10x1xf32>
    %cst_154 = arith.constant 3.200000e+01 : f32
    %443 = vector.broadcast %cst_154 : f32 to vector<10x1xf32>
    %444 = arith.divf %442, %443 : vector<10x1xf32>
    %445 = vector.broadcast %444 : vector<10x1xf32> to vector<10x32xf32>
    %446 = arith.subf %438, %445 : vector<10x32xf32>
    %447 = arith.mulf %446, %446 : vector<10x32xf32>
    %cst_155 = arith.constant dense<0.000000e+00> : vector<10xf32>
    %448 = vector.multi_reduction <add>, %447, %cst_155 [1] : vector<10x32xf32> to vector<10xf32>
    %449 = vector.shape_cast %448 : vector<10xf32> to vector<10x1xf32>
    %cst_156 = arith.constant 3.200000e+01 : f32
    %450 = vector.broadcast %cst_156 : f32 to vector<10x1xf32>
    %451 = arith.divf %449, %450 : vector<10x1xf32>
    %cst_157 = arith.constant 9.99999974E-6 : f32
    %452 = vector.broadcast %cst_157 : f32 to vector<10x1xf32>
    %453 = arith.addf %451, %452 : vector<10x1xf32>
    %454 = math.rsqrt %453 : vector<10x1xf32>
    %455 = vector.broadcast %454 : vector<10x1xf32> to vector<10x32xf32>
    %456 = arith.mulf %446, %455 : vector<10x32xf32>
    %457 = vector.broadcast %439 : vector<1x32xf32> to vector<10x32xf32>
    %458 = arith.mulf %456, %457 : vector<10x32xf32>
    %459 = vector.broadcast %440 : vector<1x32xf32> to vector<10x32xf32>
    %460 = arith.addf %458, %459 : vector<10x32xf32>
    %c0_158 = arith.constant 0 : index
    %c0_159 = arith.constant 0 : index
    %461 = vector.load %arg22[%c0_158, %c0_159] : memref<32x32xf32, #tpu.memory_space<vmem>>, vector<32x32xf32>
    %cst_160 = arith.constant dense<0.000000e+00> : vector<10x32xf32>
    %462 = tpu.matmul %460, %461, %cst_160 {dimension_numbers = #tpu.dot_dimension_numbers<[1], [0], [0], [1], [0, 0, 1, 1], [], []>} : vector<10x32xf32>, vector<32x32xf32>, vector<10x32xf32> -> vector<10x32xf32>
    %c0_161 = arith.constant 0 : index
    %c0_162 = arith.constant 0 : index
    %463 = vector.load %arg23[%c0_161, %c0_162] : memref<1x32xf32, #tpu.memory_space<vmem>>, vector<1x32xf32>
    %464 = vector.broadcast %463 : vector<1x32xf32> to vector<10x32xf32>
    %465 = arith.addf %462, %464 : vector<10x32xf32>
    %cst_163 = arith.constant 0.000000e+00 : f32
    %466 = vector.broadcast %cst_163 : f32 to vector<10x32xf32>
    %467 = arith.maximumf %465, %466 : vector<10x32xf32>
    %c0_164 = arith.constant 0 : index
    %c0_165 = arith.constant 0 : index
    %468 = vector.load %arg24[%c0_164, %c0_165] : memref<32x32xf32, #tpu.memory_space<vmem>>, vector<32x32xf32>
    %cst_166 = arith.constant dense<0.000000e+00> : vector<10x32xf32>
    %469 = tpu.matmul %467, %468, %cst_166 {dimension_numbers = #tpu.dot_dimension_numbers<[1], [0], [0], [1], [0, 0, 1, 1], [], []>} : vector<10x32xf32>, vector<32x32xf32>, vector<10x32xf32> -> vector<10x32xf32>
    %c0_167 = arith.constant 0 : index
    %c0_168 = arith.constant 0 : index
    %470 = vector.load %arg25[%c0_167, %c0_168] : memref<1x32xf32, #tpu.memory_space<vmem>>, vector<1x32xf32>
    %471 = vector.broadcast %470 : vector<1x32xf32> to vector<10x32xf32>
    %472 = arith.addf %469, %471 : vector<10x32xf32>
    %473 = arith.addf %460, %472 : vector<10x32xf32>
    %c0_169 = arith.constant 0 : index
    %c0_170 = arith.constant 0 : index
    %474 = vector.load %arg26[%c0_169, %c0_170] : memref<1x32xf32, #tpu.memory_space<vmem>>, vector<1x32xf32>
    %c0_171 = arith.constant 0 : index
    %c0_172 = arith.constant 0 : index
    %475 = vector.load %arg27[%c0_171, %c0_172] : memref<1x32xf32, #tpu.memory_space<vmem>>, vector<1x32xf32>
    %cst_173 = arith.constant dense<0.000000e+00> : vector<10xf32>
    %476 = vector.multi_reduction <add>, %473, %cst_173 [1] : vector<10x32xf32> to vector<10xf32>
    %477 = vector.shape_cast %476 : vector<10xf32> to vector<10x1xf32>
    %cst_174 = arith.constant 3.200000e+01 : f32
    %478 = vector.broadcast %cst_174 : f32 to vector<10x1xf32>
    %479 = arith.divf %477, %478 : vector<10x1xf32>
    %480 = vector.broadcast %479 : vector<10x1xf32> to vector<10x32xf32>
    %481 = arith.subf %473, %480 : vector<10x32xf32>
    %482 = arith.mulf %481, %481 : vector<10x32xf32>
    %cst_175 = arith.constant dense<0.000000e+00> : vector<10xf32>
    %483 = vector.multi_reduction <add>, %482, %cst_175 [1] : vector<10x32xf32> to vector<10xf32>
    %484 = vector.shape_cast %483 : vector<10xf32> to vector<10x1xf32>
    %cst_176 = arith.constant 3.200000e+01 : f32
    %485 = vector.broadcast %cst_176 : f32 to vector<10x1xf32>
    %486 = arith.divf %484, %485 : vector<10x1xf32>
    %cst_177 = arith.constant 9.99999974E-6 : f32
    %487 = vector.broadcast %cst_177 : f32 to vector<10x1xf32>
    %488 = arith.addf %486, %487 : vector<10x1xf32>
    %489 = math.rsqrt %488 : vector<10x1xf32>
    %490 = vector.broadcast %489 : vector<10x1xf32> to vector<10x32xf32>
    %491 = arith.mulf %481, %490 : vector<10x32xf32>
    %492 = vector.broadcast %474 : vector<1x32xf32> to vector<10x32xf32>
    %493 = arith.mulf %491, %492 : vector<10x32xf32>
    %494 = vector.broadcast %475 : vector<1x32xf32> to vector<10x32xf32>
    %495 = arith.addf %493, %494 : vector<10x32xf32>
    %c0_178 = arith.constant 0 : index
    %c0_179 = arith.constant 0 : index
    %496 = vector.load %arg28[%c0_178, %c0_179] : memref<1x32xf32, #tpu.memory_space<vmem>>, vector<1x32xf32>
    %c0_180 = arith.constant 0 : index
    %c0_181 = arith.constant 0 : index
    %497 = vector.load %arg29[%c0_180, %c0_181] : memref<1x32xf32, #tpu.memory_space<vmem>>, vector<1x32xf32>
    %cst_182 = arith.constant dense<0.000000e+00> : vector<10xf32>
    %498 = vector.multi_reduction <add>, %495, %cst_182 [1] : vector<10x32xf32> to vector<10xf32>
    %499 = vector.shape_cast %498 : vector<10xf32> to vector<10x1xf32>
    %cst_183 = arith.constant 3.200000e+01 : f32
    %500 = vector.broadcast %cst_183 : f32 to vector<10x1xf32>
    %501 = arith.divf %499, %500 : vector<10x1xf32>
    %502 = vector.broadcast %501 : vector<10x1xf32> to vector<10x32xf32>
    %503 = arith.subf %495, %502 : vector<10x32xf32>
    %504 = arith.mulf %503, %503 : vector<10x32xf32>
    %cst_184 = arith.constant dense<0.000000e+00> : vector<10xf32>
    %505 = vector.multi_reduction <add>, %504, %cst_184 [1] : vector<10x32xf32> to vector<10xf32>
    %506 = vector.shape_cast %505 : vector<10xf32> to vector<10x1xf32>
    %cst_185 = arith.constant 3.200000e+01 : f32
    %507 = vector.broadcast %cst_185 : f32 to vector<10x1xf32>
    %508 = arith.divf %506, %507 : vector<10x1xf32>
    %cst_186 = arith.constant 9.99999974E-6 : f32
    %509 = vector.broadcast %cst_186 : f32 to vector<10x1xf32>
    %510 = arith.addf %508, %509 : vector<10x1xf32>
    %511 = math.rsqrt %510 : vector<10x1xf32>
    %512 = vector.broadcast %511 : vector<10x1xf32> to vector<10x32xf32>
    %513 = arith.mulf %503, %512 : vector<10x32xf32>
    %514 = vector.broadcast %496 : vector<1x32xf32> to vector<10x32xf32>
    %515 = arith.mulf %513, %514 : vector<10x32xf32>
    %516 = vector.broadcast %497 : vector<1x32xf32> to vector<10x32xf32>
    %517 = arith.addf %515, %516 : vector<10x32xf32>
    %518 = vector.extract_strided_slice %517 {offsets = [0, 0], sizes = [1, 32], strides = [1, 1]} : vector<10x32xf32> to vector<1x32xf32>
    %c0_187 = arith.constant 0 : index
    %c0_188 = arith.constant 0 : index
    %519 = vector.load %arg30[%c0_187, %c0_188] : memref<32x6xf32, #tpu.memory_space<vmem>>, vector<32x6xf32>
    %cst_189 = arith.constant dense<0.000000e+00> : vector<1x6xf32>
    %520 = tpu.matmul %518, %519, %cst_189 {dimension_numbers = #tpu.dot_dimension_numbers<[1], [0], [0], [1], [0, 0, 1, 1], [], []>} : vector<1x32xf32>, vector<32x6xf32>, vector<1x6xf32> -> vector<1x6xf32>
    %c0_190 = arith.constant 0 : index
    %c0_191 = arith.constant 0 : index
    %521 = vector.load %arg31[%c0_190, %c0_191] : memref<1x6xf32, #tpu.memory_space<vmem>>, vector<1x6xf32>
    %522 = arith.addf %520, %521 : vector<1x6xf32>
    %c0_192 = arith.constant 0 : index
    %c0_193 = arith.constant 0 : index
    %523 = vector.load %arg32[%c0_192, %c0_193] : memref<2x6xf32, #tpu.memory_space<vmem>>, vector<1x6xf32>
    tpu.vector_store %arg32[%c0_192, %c0_193], %522 {strides = array<i32>} : memref<2x6xf32, #tpu.memory_space<vmem>>, vector<1x6xf32>,
    %524 = vector.extract_strided_slice %517 {offsets = [5, 0], sizes = [1, 32], strides = [1, 1]} : vector<10x32xf32> to vector<1x32xf32>
    %c0_194 = arith.constant 0 : index
    %c0_195 = arith.constant 0 : index
    %525 = vector.load %arg30[%c0_194, %c0_195] : memref<32x6xf32, #tpu.memory_space<vmem>>, vector<32x6xf32>
    %cst_196 = arith.constant dense<0.000000e+00> : vector<1x6xf32>
    %526 = tpu.matmul %524, %525, %cst_196 {dimension_numbers = #tpu.dot_dimension_numbers<[1], [0], [0], [1], [0, 0, 1, 1], [], []>} : vector<1x32xf32>, vector<32x6xf32>, vector<1x6xf32> -> vector<1x6xf32>
    %c0_197 = arith.constant 0 : index
    %c0_198 = arith.constant 0 : index
    %527 = vector.load %arg31[%c0_197, %c0_198] : memref<1x6xf32, #tpu.memory_space<vmem>>, vector<1x6xf32>
    %528 = arith.addf %526, %527 : vector<1x6xf32>
    %c1_199 = arith.constant 1 : index
    %c0_200 = arith.constant 0 : index
    %529 = vector.load %arg32[%c1_199, %c0_200] : memref<2x6xf32, #tpu.memory_space<vmem>>, vector<1x6xf32>
    tpu.vector_store %arg32[%c1_199, %c0_200], %528 {strides = array<i32>} : memref<2x6xf32, #tpu.memory_space<vmem>>, vector<1x6xf32>,
    return
  }
}

</mosaic_0001>

<bundles_post_ra>
// kernel: mixrx_transformer_forward.1
= control target key start
LH: loop header
LB: loop body
LE: loop exit
PB: predicated region body
PF: predicated region fallthrough
CT: control target
= control target key end

     0   :  { %s2462_s6 = smov 1   ;;  %s2463_s10 = smov 2   ;;  %s3089_s0 = inlined_call_operand.smem [shape: u32[34], index: -1, kind: input, shape index: {}] }
   0x1   :  { %s2512_s5 = sld [smem:[%s3089_s0]]   ;;  %s2464_s14 = smov 3  }
   0x2   :  { %s2517_s9 = sld [smem:[%s3089_s0 + %s2462_s6]]   ;;  %s2465_s18 = smov 4  }
   0x3   :  { %s2522_s13 = sld [smem:[%s3089_s0 + %s2463_s10]]   ;;  %s2466_s22 = smov 5  }
   0x4   :  { %s2527_s17 = sld [smem:[%s3089_s0 + %s2464_s14]]   ;;  %s2467_s26 = smov 6  }
   0x5   :  { %s2532_s21 = sld [smem:[%s3089_s0 + %s2465_s18]]   ;;  %s2468_s30 = smov 7  }
   0x6   :  { %s2537_s25 = sld [smem:[%s3089_s0 + %s2466_s22]]   ;;  %s2469_s4 = smov 8  }
   0x7   :  { %s2542_s29 = sld [smem:[%s3089_s0 + %s2467_s26]]   ;;  %s2470_s10 = smov 9  }
   0x8   :  { %s2547_s3 = sld [smem:[%s3089_s0 + %s2468_s30]]   ;;  %s2471_s15 = smov 10  }
   0x9   :  { %s2552_s8 = sld [smem:[%s3089_s0 + %s2469_s4]]   ;;  %s2472_s20 = smov 11  }
   0xa   :  { %s2557_s14 = sld [smem:[%s3089_s0 + %s2470_s10]]   ;;  %s2473_s26 = smov 12  }
   0xb   :  { %s2562_s19 = sld [smem:[%s3089_s0 + %s2471_s15]]   ;;  %s2474_s1 = smov 13  }
   0xc   :  { %s2567_s24 = sld [smem:[%s3089_s0 + %s2472_s20]]   ;;  %s2475_s7 = smov 14  }
   0xd   :  { %s2572_s30 = sld [smem:[%s3089_s0 + %s2473_s26]]   ;;  %s2476_s15 = smov 15  }
   0xe   :  { %s2577_s6 = sld [smem:[%s3089_s0 + %s2474_s1]]   ;;  %s2477_s22 = smov 16  }
   0xf   :  { %s2582_s12 = sld [smem:[%s3089_s0 + %s2475_s7]]   ;;  %s2478_s28 = smov 17  }
  0x10   :  { %s2587_s20 = sld [smem:[%s3089_s0 + %s2476_s15]]   ;;  %s2479_s7 = smov 18  }
  0x11   :  { %3093 = sst [smem:[#allocation10_spill]] %s2562_s19  ;;  %s2480_s15 = smov 19  }
  0x12   :  { %s2592_s27 = sld [smem:[%s3089_s0 + %s2477_s22]]   ;;  %s2481_s22 = smov 20  }
  0x13   :  { %s2597_s4 = sld [smem:[%s3089_s0 + %s2478_s28]]   ;;  %s2482_s28 = smov 21  }
  0x14   :  { %3094 = sst [smem:[#allocation11_spill]] %s2577_s6 }
  0x15   :  { %s2602_s6 = sld [smem:[%s3089_s0 + %s2479_s7]]   ;;  %s2483_s7 = smov 22  }
  0x16   :  { %3095 = sst [smem:[#allocation12_spill]] %s2587_s20 }
  0x17   :  { %s2607_s20 = sld [smem:[%s3089_s0 + %s2480_s15]]   ;;  %s2484_s15 = smov 23  }
  0x18   :  { %s2612_s19 = sld [smem:[%s3089_s0 + %s2481_s22]]   ;;  %s2485_s22 = smov 24  }
  0x19   :  { %3096 = sst [smem:[#allocation13_spill]] %s2597_s4 }
  0x1a   :  { %s2617_s4 = sld [smem:[%s3089_s0 + %s2482_s28]]   ;;  %s2486_s28 = smov 25  }
  0x1b   :  { %3097 = sst [smem:[#allocation14_spill]] %s2602_s6 }
  0x1c   :  { %s2622_s6 = sld [smem:[%s3089_s0 + %s2483_s7]]   ;;  %s2487_s7 = smov 26  }
  0x1d   :  { %3098 = sst [smem:[#allocation15_spill]] %s2607_s20 }
  0x1e   :  { %3099 = sst [smem:[#allocation16_spill]] %s2612_s19 }
  0x1f   :  { %s2627_s20 = sld [smem:[%s3089_s0 + %s2484_s15]]   ;;  %s2488_s15 = smov 27  }
  0x20   :  { %3100 = sst [smem:[#allocation17_spill]] %s2617_s4 }
  0x21   :  { %s2632_s19 = sld [smem:[%s3089_s0 + %s2485_s22]]   ;;  %s2489_s22 = smov 28  }
  0x22   :  { %3101 = sst [smem:[#allocation18_spill]] %s2622_s6 }
  0x23   :  { %s2637_s4 = sld [smem:[%s3089_s0 + %s2486_s28]]   ;;  %s2490_s28 = smov 29  }
  0x24   :  { %s2642_s6 = sld [smem:[%s3089_s0 + %s2487_s7]]   ;;  %s2491_s7 = smov 30  }
  0x25   :  { %3102 = sst [smem:[#allocation19_spill]] %s2627_s20 }
  0x26   :  { %s2647_s20 = sld [smem:[%s3089_s0 + %s2488_s15]]   ;;  %s2492_s15 = smov 31  }
  0x27   :  { %3103 = sst [smem:[#allocation20_spill]] %s2632_s19 }
  0x28   :  { %s2652_s19 = sld [smem:[%s3089_s0 + %s2489_s22]]   ;;  %s2493_s22 = smov 32  }
  0x29   :  { %3104 = sst [smem:[#allocation21_spill]] %s2637_s4 }
  0x2a   :  { %3105 = sst [smem:[#allocation22_spill]] %s2642_s6 }
  0x2b   :  { %s2657_s4 = sld [smem:[%s3089_s0 + %s2490_s28]]   ;;  %s2494_s28 = smov 33  }
  0x2c   :  { %3106 = sst [smem:[#allocation23_spill]] %s2647_s20 }
  0x2d   :  { %s2662_s6 = sld [smem:[%s3089_s0 + %s2491_s7]]  }
  0x2e   :  { %3107 = sst [smem:[#allocation24_spill]] %s2652_s19 }
  0x2f   :  { %s2667_s20 = sld [smem:[%s3089_s0 + %s2492_s15]]  }
  0x30   :  { %s2672_s19 = sld [smem:[%s3089_s0 + %s2493_s22]]  }
  0x31   :  { %3108 = sst [smem:[#allocation25_spill]] %s2657_s4 }
  0x32   :  { %s2677_s4 = sld [smem:[%s3089_s0 + %s2494_s28]]  }
  0x33   :  { %73 = vsyncpa [#allocation5], 0  ;;  %v172_v0 = vld [vmem:[%s2527_s17 + $0x8] sm:$0xff]  ;;  %v171_v1 = vld [vmem:[%s2527_s17] sm:$0xff]  ;;  %vm177_vm0 = vcmask 130048   ;;  %s2495_s0 = smov 64  }
  0x34   :  { %v139_v2 = vld [vmem:[%s2512_s5] sm:$0xff]  ;;  %216 = vmatpush.msra.mxu0 %v172_v0  ;;  %v2689_v5 = vld [vmem:[%s2547_s3 + $0x18] sm:$0xff]  ;;  %v2692_v6 = vld [vmem:[%s2547_s3 + $0x10] sm:$0xff]  ;;  %v2496_v13 = vmov 0.0  }
  0x35   :  { %v2683_v3 = vld [vmem:[%s2517_s9] ss:$0 sm:$0xff]  ;;  %345 = vmatpush.msra.mxu2 %v2689_v5  ;;  %v2697_v8 = vld [vmem:[%s2547_s3 + $0x8] sm:$0xff]  ;;  %v254_v10 = vld [vmem:[%s2537_s25 + $0x18] sm:$0xff]  ;;  %415 = vmatpush.msra.mxu3 %v2689_v5 }
  0x36   :  { %v2686_v4 = vld [vmem:[%s2522_s13] ss:$0 sm:$0xff]  ;;  %217 = vmatpush.msra.mxu0 %v171_v1  ;;  %v151_v7 = vmul.f32 %v2683_v3, %v139_v2  ;;  %296 = vmatpush.msra.mxu1 %v254_v10 }
  0x37   :  { %v2304_v9 = vld [vmem:[%s2552_s8] ss:$0 sm:$0xff]  ;;  %346 = vmatpush.msra.mxu2 %v2692_v6  ;;  %416 = vmatpush.msra.mxu3 %v2692_v6 }
  0x38   :  { %v163_v11 = vadd.f32 %v2686_v4, %v151_v7  ;;  %v2705_v12 = vld [vmem:[%s2547_s3] sm:$0xff]  ;;  %375 = vrot.lane.b32.xlu0 %v2304_v9, %s2495_s0 }
  0x39   :  { %347 = vmatpush.msra.mxu2 %v2697_v8  ;;  %417 = vmatpush.msra.mxu3 %v2697_v8 }
  0x3a   :  { %2176 = vmatmul.msk.f32.vlgmr.msra.gmra.mxu0 %vm177_vm0, %v163_v11 }
  0x3b   :  { %348 = vmatpush.msra.mxu2 %v2705_v12  ;;  %418 = vmatpush.msra.mxu3 %v2705_v12 }
  0x3c   :  { %349 = vmatmul.f32.vlgmr.msra.gmra.mxu2 %v2496_v13 }
  0x3d   :  { %74 = vsyncpa [#allocation7], 0  ;;  %480 = vmatpush.msrb.mxu2 %v2689_v5  ;;  %545 = vmatpush.msrb.mxu3 %v2689_v5  ;;  %v253_v14 = vld [vmem:[%s2537_s25 + $0x10] sm:$0xff]  ;;  %v252_v15 = vld [vmem:[%s2537_s25 + $0x8] sm:$0xff]  ;;  %vm259_vm1 = vcmask 261120   ;;  %s2497_s9 = smov 96  }
  0x3e   :  { %297 = vmatpush.msra.mxu1 %v253_v14  ;;  %v251_v16 = vld [vmem:[%s2537_s25] sm:$0xff]  ;;  %v140_v43 = vld [vmem:[%s2512_s5 + $0x8] sm:$0xff]  ;;  %s3110_s13 = sld [smem:[#allocation11_spill]]  ;;  %s2498_s25 = smov 112  }
  0x3f   :  { %481 = vmatpush.msrb.mxu2 %v2692_v6  ;;  %546 = vmatpush.msrb.mxu3 %v2692_v6  ;;  %v2730_v17 = vld [vmem:[%s2532_s21] ss:$0 sm:$0xff]  ;;  %v152_v44 = vmul.f32 %v2683_v3, %v140_v43  ;;  %s3111_s17 = sld [smem:[#allocation12_spill]]  ;;  %s2500_s3 = smov 104  }
  0x40   :  { %298 = vmatpush.msra.mxu1 %v252_v15  ;;  %v2739_v24 = vld [vmem:[%s2542_s29] ss:$0 sm:$0xff]  ;;  %s3112_s21 = sld [smem:[#allocation13_spill]]  ;;  %s2499_s29 = smov 120  }
  0x41   :  { %482 = vmatpush.msrb.mxu2 %v2697_v8  ;;  %547 = vmatpush.msrb.mxu3 %v2697_v8  ;;  %v164_v45 = vadd.f32 %v2686_v4, %v152_v44  ;;  %s3113_s8 = sld [smem:[#allocation14_spill]]  ;;  %s2129_s23 = sshll.u32 %s2677_s4, 4  ;;  %s2130_s23 = int_to_ptr.hbm [resolvable:$true] %s2129_s23 }
  0x42   :  { %299 = vmatpush.msra.mxu1 %v251_v16  ;;  %s3119_s7 = sld [smem:[#allocation19_spill]]  ;;  %s2422_s26 = sshra.s32 %s2130_s23, 4  ;;  %s2423_s26 = int_to_ptr.hbm [resolvable:$true] %s2422_s26 }
  0x43   :  { %483 = vmatpush.msrb.mxu2 %v2705_v12  ;;  %548 = vmatpush.msrb.mxu3 %v2705_v12  ;;  %s3120_s10 = sld [smem:[#allocation21_spill]]  ;;  %s2424_s28 = scalar_lea.hbm %s2423_s26, 8 }
  0x44   :  { %2177 = vmatmul.msk.f32.gmra.mxu0 %vm177_vm0, %v164_v45  ;;  %s3121_s11 = sld [smem:[#allocation22_spill]]  ;;  %p2425_p0 = scmp.ne.s32.totalorder %s2423_s26, %s2424_s28 }
  0x45   :  { %610 = vmatpush.msra.mxu2 %v2689_v5  ;;  %s3122_s15 = sld [smem:[#allocation23_spill]]  ;;  %s2426_s1 = scalar_lea.hbm %s2677_s4, 8 }
  0x46   :  { %s3123_s16 = sld [smem:[#allocation24_spill]]  ;;  %p2427_p1 = scmp.lt.s32.totalorder %s2423_s26, %s2677_s4 }
  0x47   :  { %611 = vmatpush.msra.mxu2 %v2692_v6  ;;  %s3124_s18 = sld [smem:[#allocation25_spill]]  ;;  %p2428_p2 = scmp.lt.s32.totalorder %s2426_s1, %s2424_s28 }
  0x49   :  { %612 = vmatpush.msra.mxu2 %v2697_v8  ;;  %p2429_p3 = por %p2428_p2, %p2427_p1 }
  0x4b   :  { %613 = vmatpush.msra.mxu2 %v2705_v12  ;;  %p2430_p4 = pnand %p2429_p3, %p2425_p0 }
  0xaa   :  { %v2734_v21 = vpop.permute.xlu0 %375 }
  0xb7   :  { %v219_v18 = vpop.f32.mrf.mxu0 }
  0xb8   :  { %v220_v19 = vadd.f32 %v2730_v17, %v219_v18 }
  0xba   :  { %v243_v20 = vmax.f32 %v220_v19, 0.0 }
  0xbc   :  { %2184 = vmatmul.msk.f32.vlgmr.msra.gmra.mxu1 %vm259_vm1, %v243_v20 }
  0xbf   :  { %v350_v22 = vpop.f32.mrf.mxu2 }
  0xc0   :  { %v378_v23 = vadd.f32 %v2734_v21, %v350_v22 }
  0xc1   :  { %v222_v49 = vpop.f32.mrf.mxu0 }
  0xc2   :  { %380 = vrot.lane.b32.xlu0 %v378_v23, %s2495_s0  ;;  %v223_v50 = vadd.f32 %v2730_v17, %v222_v49 }
  0xc4   :  { %v244_v51 = vmax.f32 %v223_v50, 0.0 }
  0xc6   :  { %2185 = vmatmul.msk.f32.gmra.mxu1 %vm259_vm1, %v244_v51 }
 0x134   :  { %v381_v38 = vpop.permute.xlu0 %380 }
 0x139   :  { %v301_v25 = vpop.f32.mrf.mxu1 }
 0x13a   :  { %v302_v26 = vadd.f32 %v2739_v24, %v301_v25 }
 0x13c   :  { %v353_v27 = vadd.f32 %v350_v22, %v302_v26  ;;  %v141_v22 = vld [vmem:[%s2512_s5 + $0x10] sm:$0xff] }
 0x13d   :  { %v153_v23 = vmul.f32 %v2683_v3, %v141_v22 }
 0x13e   :  { %v2192_v28 = vmul.f32 -1.442695, %v353_v27 }
 0x13f   :  { %v165_v25 = vadd.f32 %v2686_v4, %v153_v23 }
 0x140   :  { %2320 = vpow2.f32 %v2192_v28 }
 0x141   :  { %2178 = vmatmul.msk.f32.gmra.mxu0 %vm177_vm0, %v165_v25 }
 0x143   :  { %v304_v60 = vpop.f32.mrf.mxu1 }
 0x144   :  { %v305_v61 = vadd.f32 %v2739_v24, %v304_v60 }
 0x146   :  { %v2321_v29 = vpop.eup %2320 }
 0x147   :  { %v357_v30 = vadd.f32 1.0, %v2321_v29 }
 0x149   :  { %2322 = vrcp.f32 %v357_v30  ;;  %v369_v34 = vand.u32 2147483648, %v357_v30  ;;  %v367_v36 = vand.u32 2147483647, %v357_v30  ;;  %vm363_vm3 = vweird.f32 %v357_v30 }
 0x14b   :  { %v370_v39 = vor.u32 1.1754944e-38, %v369_v34  ;;  %vm368_vm5 = vcmp.eq.f32.partialorder %v367_v36, 8.507059e+37 }
 0x14f   :  { %v2323_v31 = vpop.eup %2322 }
 0x150   :  { %v359_v32 = vmul.f32 %v2323_v31, %v357_v30  ;;  %vm364_vm2 = vweird.f32 %v2323_v31 }
 0x151   :  { %vm365_vm4 = vmor %vm363_vm3, %vm364_vm2 }
 0x152   :  { %v360_v33 = vsub.f32 1.0, %v359_v32 }
 0x154   :  { %v361_v35 = vmul.f32 %v2323_v31, %v360_v33 }
 0x156   :  { %v362_v37 = vadd.f32 %v2323_v31, %v361_v35 }
 0x158   :  { %v366_v40 = vsel %vm365_vm4, %v2323_v31, %v362_v37 }
 0x159   :  { %v371_v41 = vsel %vm368_vm5, %v370_v39, %v366_v40 }
 0x15a   :  { %v383_v42 = vmul.f32 %v381_v38, %v371_v41  ;;  %v390_v52 = vsub.f32 1.0, %v371_v41  ;;  %v396_v55 = vmul.f32 0.0, %v371_v41 }
 0x15c   :  { %385 = vrot.lane.b32.xlu1 %v383_v42, %s2495_s0 }
 0x1be   :  { %v225_v29 = vpop.f32.mrf.mxu0 }
 0x1bf   :  { %v226_v30 = vadd.f32 %v2730_v17, %v225_v29 }
 0x1c1   :  { %v245_v31 = vmax.f32 %v226_v30, 0.0 }
 0x1c3   :  { %2186 = vmatmul.msk.f32.gmra.mxu1 %vm259_vm1, %v245_v31 }
 0x1ce   :  { %v386_v46 = vpop.permute.xlu1 %385 }
 0x1cf   :  { %v388_v47 = vadd.f32 %v386_v46, %v302_v26 }
 0x1d1   :  { %2324 = vtanh.f32 %v388_v47 }
 0x1d7   :  { %v2325_v48 = vpop.eup %2324 }
 0x1d8   :  { %392 = vrot.lane.b32.xlu1 %v2325_v48, %s2497_s9 }
 0x240   :  { %v307_v40 = vpop.f32.mrf.mxu1 }
 0x241   :  { %v308_v41 = vadd.f32 %v2739_v24, %v307_v40 }
 0x24a   :  { %v393_v53 = vpop.permute.xlu1 %392 }
 0x24b   :  { %v395_v54 = vmul.f32 %v393_v53, %v390_v52 }
 0x24d   :  { %v397_v56 = vadd.f32 %v396_v55, %v395_v54 }
 0x24f   :  { %399 = vrot.lane.b32.xlu2 %v397_v56, %s2497_s9 }
 0x2a9   :  { %v400_v57 = vpop.permute.xlu2 %399 }
 0x2aa   :  { %2193 = vmatmul.msk.f32.vlgmr.msra.gmra.mxu3 %vm259_vm1, %v400_v57 }
 0x2ab   :  { %675 = vmatpush.msra.mxu3 %v2689_v5 }
 0x2ad   :  { %676 = vmatpush.msra.mxu3 %v2692_v6 }
 0x2af   :  { %677 = vmatpush.msra.mxu3 %v2697_v8 }
 0x2b1   :  { %678 = vmatpush.msra.mxu3 %v2705_v12 }
 0x32d   :  { %v420_v58 = vpop.f32.mrf.mxu3 }
 0x32e   :  { %v443_v59 = vadd.f32 %v420_v58, %v2734_v21  ;;  %v423_v62 = vadd.f32 %v420_v58, %v305_v61  ;;  %v142_v58 = vld [vmem:[%s2512_s5 + $0x18] sm:$0xff] }
 0x330   :  { %445 = vrot.lane.b32.xlu2 %v443_v59, %s2495_s0  ;;  %v2194_v63 = vmul.f32 -1.442695, %v423_v62  ;;  %v154_v59 = vmul.f32 %v2683_v3, %v142_v58 }
 0x332   :  { %2326 = vpow2.f32 %v2194_v63  ;;  %v166_v60 = vadd.f32 %v2686_v4, %v154_v59 }
 0x334   :  { %2179 = vmatmul.msk.f32.gmra.mxu0 %vm177_vm0, %v166_v60 }
 0x338   :  { %v2327_v0 = vpop.eup %2326 }
 0x339   :  { %v427_v1 = vadd.f32 1.0, %v2327_v0 }
 0x33b   :  { %2328 = vrcp.f32 %v427_v1  ;;  %v439_v13 = vand.u32 2147483648, %v427_v1  ;;  %vm433_vm7 = vweird.f32 %v427_v1  ;;  %v437_v14 = vand.u32 2147483647, %v427_v1 }
 0x33d   :  { %v440_v16 = vor.u32 1.1754944e-38, %v439_v13  ;;  %vm438_vm9 = vcmp.eq.f32.partialorder %v437_v14, 8.507059e+37 }
 0x341   :  { %v2329_v2 = vpop.eup %2328 }
 0x342   :  { %v429_v7 = vmul.f32 %v2329_v2, %v427_v1  ;;  %vm434_vm6 = vweird.f32 %v2329_v2 }
 0x343   :  { %vm435_vm8 = vmor %vm433_vm7, %vm434_vm6 }
 0x344   :  { %v430_v9 = vsub.f32 1.0, %v429_v7 }
 0x346   :  { %v431_v10 = vmul.f32 %v2329_v2, %v430_v9 }
 0x348   :  { %v432_v11 = vadd.f32 %v2329_v2, %v431_v10 }
 0x34a   :  { %v436_v15 = vsel %vm435_vm8, %v2329_v2, %v432_v11 }
 0x34b   :  { %v441_v19 = vsel %vm438_vm9, %v440_v16, %v436_v15 }
 0x34c   :  { %v455_v32 = vsub.f32 1.0, %v441_v19  ;;  %v461_v34 = vmul.f32 %v441_v19, %v397_v56 }
 0x38a   :  { %v446_v18 = vpop.permute.xlu2 %445 }
 0x38b   :  { %v448_v20 = vmul.f32 %v446_v18, %v441_v19 }
 0x38d   :  { %450 = vrot.lane.b32.xlu0 %v448_v20, %s2495_s0 }
 0x3b1   :  { %v228_v10 = vpop.f32.mrf.mxu0 }
 0x3b2   :  { %v229_v11 = vadd.f32 %v2730_v17, %v228_v10  ;;  %v144_v10 = vld [vmem:[%s2512_s5 + $0x28] sm:$0xff] }
 0x3b4   :  { %v246_v13 = vmax.f32 %v229_v11, 0.0  ;;  %v156_v11 = vmul.f32 %v2683_v3, %v144_v10 }
 0x3b6   :  { %2187 = vmatmul.msk.f32.gmra.mxu1 %vm259_vm1, %v246_v13  ;;  %v168_v13 = vadd.f32 %v2686_v4, %v156_v11 }
 0x3ff   :  { %v451_v26 = vpop.permute.xlu0 %450 }
 0x400   :  { %v453_v27 = vadd.f32 %v451_v26, %v305_v61 }
 0x402   :  { %2330 = vtanh.f32 %v453_v27 }
 0x408   :  { %v2331_v28 = vpop.eup %2330 }
 0x409   :  { %457 = vrot.lane.b32.xlu1 %v2331_v28, %s2497_s9 }
 0x433   :  { %v310_v18 = vpop.f32.mrf.mxu1 }
 0x434   :  { %v311_v19 = vadd.f32 %v2739_v24, %v310_v18 }
 0x47b   :  { %v458_v33 = vpop.permute.xlu1 %457 }
 0x47c   :  { %v460_v35 = vmul.f32 %v458_v33, %v455_v32 }
 0x47e   :  { %v462_v36 = vadd.f32 %v461_v34, %v460_v35  ;;  %v143_v34 = vld [vmem:[%s2512_s5 + $0x20] sm:$0xff] }
 0x47f   :  { %v155_v35 = vmul.f32 %v2683_v3, %v143_v34 }
 0x480   :  { %464 = vrot.lane.b32.xlu2 %v462_v36, %s2497_s9 }
 0x4da   :  { %v465_v37 = vpop.permute.xlu2 %464 }
 0x4db   :  { %2195 = vmatmul.msk.f32.vlgmr.msrb.gmra.mxu2 %vm259_vm1, %v465_v37 }
 0x4dc   :  { %740 = vmatpush.msrb.mxu2 %v2689_v5 }
 0x4de   :  { %741 = vmatpush.msrb.mxu2 %v2692_v6 }
 0x4e0   :  { %742 = vmatpush.msrb.mxu2 %v2697_v8 }
 0x4e2   :  { %743 = vmatpush.msrb.mxu2 %v2705_v12 }
 0x55e   :  { %v485_v38 = vpop.f32.mrf.mxu2 }
 0x55f   :  { %v508_v39 = vadd.f32 %v485_v38, %v2734_v21  ;;  %v488_v42 = vadd.f32 %v485_v38, %v308_v41 }
 0x561   :  { %510 = vrot.lane.b32.xlu0 %v508_v39, %s2495_s0  ;;  %v2196_v43 = vmul.f32 -1.442695, %v488_v42 }
 0x563   :  { %2332 = vpow2.f32 %v2196_v43 }
 0x569   :  { %v2333_v44 = vpop.eup %2332 }
 0x56a   :  { %v492_v45 = vadd.f32 1.0, %v2333_v44 }
 0x56c   :  { %2334 = vrcp.f32 %v492_v45  ;;  %v504_v51 = vand.u32 2147483648, %v492_v45  ;;  %vm498_vm11 = vweird.f32 %v492_v45  ;;  %v502_v52 = vand.u32 2147483647, %v492_v45 }
 0x56e   :  { %v505_v54 = vor.u32 1.1754944e-38, %v504_v51  ;;  %vm503_vm13 = vcmp.eq.f32.partialorder %v502_v52, 8.507059e+37 }
 0x572   :  { %v2335_v46 = vpop.eup %2334 }
 0x573   :  { %v494_v47 = vmul.f32 %v2335_v46, %v492_v45  ;;  %vm499_vm10 = vweird.f32 %v2335_v46 }
 0x574   :  { %vm500_vm12 = vmor %vm498_vm11, %vm499_vm10 }
 0x575   :  { %v495_v48 = vsub.f32 1.0, %v494_v47 }
 0x577   :  { %v496_v49 = vmul.f32 %v2335_v46, %v495_v48 }
 0x579   :  { %v497_v50 = vadd.f32 %v2335_v46, %v496_v49 }
 0x57b   :  { %v501_v53 = vsel %vm500_vm12, %v2335_v46, %v497_v50 }
 0x57c   :  { %v506_v56 = vsel %vm503_vm13, %v505_v54, %v501_v53 }
 0x57d   :  { %v520_v0 = vsub.f32 1.0, %v506_v56  ;;  %v526_v2 = vmul.f32 %v506_v56, %v462_v36  ;;  %v167_v36 = vadd.f32 %v2686_v4, %v155_v35 }
 0x57f   :  { %2180 = vmatmul.msk.f32.gmra.mxu0 %vm177_vm0, %v167_v36 }
 0x587   :  { %2181 = vmatmul.msk.f32.gmra.mxu0 %vm177_vm0, %v168_v13 }
 0x5d3   :  { %v511_v55 = vpop.permute.xlu0 %510 }
 0x5d4   :  { %v513_v57 = vmul.f32 %v511_v55, %v506_v56 }
 0x5d6   :  { %515 = vrot.lane.b32.xlu1 %v513_v57, %s2495_s0 }
 0x5fc   :  { %v231_v40 = vpop.f32.mrf.mxu0 }
 0x604   :  { %v234_v18 = vpop.f32.mrf.mxu0 }
 0x648   :  { %v516_v61 = vpop.permute.xlu1 %515 }
 0x649   :  { %v518_v62 = vadd.f32 %v516_v61, %v308_v41  ;;  %v232_v41 = vadd.f32 %v2730_v17, %v231_v40 }
 0x64b   :  { %2336 = vtanh.f32 %v518_v62  ;;  %v247_v42 = vmax.f32 %v232_v41, 0.0 }
 0x64d   :  { %2188 = vmatmul.msk.f32.gmra.mxu1 %vm259_vm1, %v247_v42 }
 0x651   :  { %v2337_v63 = vpop.eup %2336 }
 0x652   :  { %522 = vrot.lane.b32.xlu2 %v2337_v63, %s2497_s9 }
 0x6ac   :  { %v523_v1 = vpop.permute.xlu2 %522 }
 0x6ad   :  { %v525_v7 = vmul.f32 %v523_v1, %v520_v0 }
 0x6af   :  { %v527_v9 = vadd.f32 %v526_v2, %v525_v7 }
 0x6b1   :  { %529 = vrot.lane.b32.xlu0 %v527_v9, %s2497_s9 }
 0x6ca   :  { %v313_v51 = vpop.f32.mrf.mxu1 }
 0x6cb   :  { %v314_v52 = vadd.f32 %v2739_v24, %v313_v51 }
 0x723   :  { %v530_v14 = vpop.permute.xlu0 %529 }
 0x724   :  { %2197 = vmatmul.msk.f32.vlgmr.msrb.gmra.mxu3 %vm259_vm1, %v530_v14 }
 0x725   :  { %805 = vmatpush.msrb.mxu3 %v2689_v5 }
 0x727   :  { %806 = vmatpush.msrb.mxu3 %v2692_v6 }
 0x729   :  { %807 = vmatpush.msrb.mxu3 %v2697_v8 }
 0x72b   :  { %808 = vmatpush.msrb.mxu3 %v2705_v12 }
 0x7a7   :  { %v550_v15 = vpop.f32.mrf.mxu3 }
 0x7a8   :  { %v573_v16 = vadd.f32 %v550_v15, %v2734_v21  ;;  %v553_v20 = vadd.f32 %v550_v15, %v311_v19 }
 0x7aa   :  { %575 = vrot.lane.b32.xlu1 %v573_v16, %s2495_s0  ;;  %v2198_v22 = vmul.f32 -1.442695, %v553_v20 }
 0x7ac   :  { %2338 = vpow2.f32 %v2198_v22 }
 0x7b2   :  { %v2339_v23 = vpop.eup %2338 }
 0x7b3   :  { %v557_v25 = vadd.f32 1.0, %v2339_v23 }
 0x7b5   :  { %2340 = vrcp.f32 %v557_v25  ;;  %v569_v27 = vand.u32 2147483648, %v557_v25  ;;  %vm563_vm15 = vweird.f32 %v557_v25  ;;  %v567_v28 = vand.u32 2147483647, %v557_v25 }
 0x7b7   :  { %v570_v30 = vor.u32 1.1754944e-38, %v569_v27  ;;  %vm568_vm3 = vcmp.eq.f32.partialorder %v567_v28, 8.507059e+37 }
 0x7bb   :  { %v2341_v5 = vpop.eup %2340 }
 0x7bc   :  { %v559_v6 = vmul.f32 %v2341_v5, %v557_v25  ;;  %vm564_vm14 = vweird.f32 %v2341_v5 }
 0x7bd   :  { %vm565_vm2 = vmor %vm563_vm15, %vm564_vm14 }
 0x7be   :  { %v560_v8 = vsub.f32 1.0, %v559_v6 }
 0x7c0   :  { %v561_v26 = vmul.f32 %v2341_v5, %v560_v8 }
 0x7c2   :  { %v562_v12 = vadd.f32 %v2341_v5, %v561_v26 }
 0x7c4   :  { %v566_v29 = vsel %vm565_vm2, %v2341_v5, %v562_v12 }
 0x7c5   :  { %v571_v32 = vsel %vm568_vm3, %v570_v30, %v566_v29 }
 0x7c6   :  { %v585_v43 = vsub.f32 1.0, %v571_v32  ;;  %v591_v45 = vmul.f32 %v571_v32, %v527_v9 }
 0x81c   :  { %v576_v31 = vpop.permute.xlu1 %575 }
 0x81d   :  { %v578_v33 = vmul.f32 %v576_v31, %v571_v32 }
 0x81f   :  { %580 = vrot.lane.b32.xlu2 %v578_v33, %s2495_s0 }
 0x879   :  { %v581_v37 = vpop.permute.xlu2 %580 }
 0x87a   :  { %v583_v38 = vadd.f32 %v581_v37, %v311_v19  ;;  %v235_v19 = vadd.f32 %v2730_v17, %v234_v18 }
 0x87c   :  { %2342 = vtanh.f32 %v583_v38  ;;  %v248_v20 = vmax.f32 %v235_v19, 0.0 }
 0x87e   :  { %2189 = vmatmul.msk.f32.gmra.mxu1 %vm259_vm1, %v248_v20 }
 0x882   :  { %v2343_v39 = vpop.eup %2342 }
 0x883   :  { %587 = vrot.lane.b32.xlu0 %v2343_v39, %s2497_s9 }
 0x8f5   :  { %v588_v44 = vpop.permute.xlu0 %587 }
 0x8f6   :  { %v590_v46 = vmul.f32 %v588_v44, %v585_v43 }
 0x8f8   :  { %v592_v47 = vadd.f32 %v591_v45, %v590_v46  ;;  %v145_v45 = vld [vmem:[%s2512_s5 + $0x30] sm:$0xff] }
 0x8f9   :  { %v157_v46 = vmul.f32 %v2683_v3, %v145_v45 }
 0x8fa   :  { %594 = vrot.lane.b32.xlu1 %v592_v47, %s2497_s9 }
 0x8fb   :  { %v316_v27 = vpop.f32.mrf.mxu1 }
 0x8fc   :  { %v317_v28 = vadd.f32 %v2739_v24, %v316_v27 }
 0x96c   :  { %v595_v48 = vpop.permute.xlu1 %594 }
 0x96d   :  { %2199 = vmatmul.msk.f32.vlgmr.msra.gmra.mxu2 %vm259_vm1, %v595_v48 }
 0x9f0   :  { %v615_v49 = vpop.f32.mrf.mxu2 }
 0x9f1   :  { %v638_v50 = vadd.f32 %v615_v49, %v2734_v21  ;;  %v618_v53 = vadd.f32 %v615_v49, %v314_v52 }
 0x9f3   :  { %640 = vrot.lane.b32.xlu2 %v638_v50, %s2495_s0  ;;  %v2200_v54 = vmul.f32 -1.442695, %v618_v53 }
 0x9f5   :  { %2344 = vpow2.f32 %v2200_v54 }
 0x9fb   :  { %v2345_v55 = vpop.eup %2344 }
 0x9fc   :  { %v622_v56 = vadd.f32 1.0, %v2345_v55 }
 0x9fe   :  { %2346 = vrcp.f32 %v622_v56  ;;  %v634_v62 = vand.u32 2147483648, %v622_v56  ;;  %vm628_vm5 = vweird.f32 %v622_v56  ;;  %v632_v63 = vand.u32 2147483647, %v622_v56 }
 0xa00   :  { %v635_v1 = vor.u32 1.1754944e-38, %v634_v62  ;;  %vm633_vm7 = vcmp.eq.f32.partialorder %v632_v63, 8.507059e+37 }
 0xa04   :  { %v2347_v57 = vpop.eup %2346 }
 0xa05   :  { %v624_v58 = vmul.f32 %v2347_v57, %v622_v56  ;;  %vm629_vm4 = vweird.f32 %v2347_v57 }
 0xa06   :  { %vm630_vm6 = vmor %vm628_vm5, %vm629_vm4  ;;  %vm888_vm5 = vcmask 253952  }
 0xa07   :  { %v625_v59 = vsub.f32 1.0, %v624_v58 }
 0xa09   :  { %v626_v60 = vmul.f32 %v2347_v57, %v625_v59 }
 0xa0b   :  { %v627_v61 = vadd.f32 %v2347_v57, %v626_v60 }
 0xa0d   :  { %v631_v0 = vsel %vm630_vm6, %v2347_v57, %v627_v61  ;;  %vm890_vm6 = vcmask 257024  }
 0xa0e   :  { %v636_v7 = vsel %vm633_vm7, %v635_v1, %v631_v0  ;;  %vm894_vm7 = vcmask 261124  }
 0xa0f   :  { %v650_v22 = vsub.f32 1.0, %v636_v7  ;;  %v656_v25 = vmul.f32 %v636_v7, %v592_v47  ;;  %v169_v47 = vadd.f32 %v2686_v4, %v157_v46 }
 0xa11   :  { %2182 = vmatmul.msk.f32.gmra.mxu0 %vm177_vm0, %v169_v47 }
 0xa4d   :  { %v641_v2 = vpop.permute.xlu2 %640 }
 0xa4e   :  { %v643_v9 = vmul.f32 %v641_v2, %v636_v7 }
 0xa50   :  { %645 = vrot.lane.b32.xlu0 %v643_v9, %s2495_s0 }
 0xa8e   :  { %v237_v56 = vpop.f32.mrf.mxu0 }
 0xa8f   :  { %v238_v57 = vadd.f32 %v2730_v17, %v237_v56  ;;  %v854_v56 = vld [vmem:[%s2557_s14 + $0x8] sm:$0xff] }
 0xa91   :  { %v249_v58 = vmax.f32 %v238_v57, 0.0  ;;  %v853_v57 = vld [vmem:[%s2557_s14] sm:$0xff] }
 0xa93   :  { %2190 = vmatmul.msk.f32.gmra.mxu1 %vm259_vm1, %v249_v58 }
 0xac2   :  { %v646_v14 = vpop.permute.xlu0 %645 }
 0xac3   :  { %v648_v15 = vadd.f32 %v646_v14, %v314_v52 }
 0xac5   :  { %2348 = vtanh.f32 %v648_v15 }
 0xacb   :  { %v2349_v16 = vpop.eup %2348 }
 0xacc   :  { %652 = vrot.lane.b32.xlu1 %v2349_v16, %s2497_s9 }
 0xb10   :  { %v319_v62 = vpop.f32.mrf.mxu1 }
 0xb11   :  { %v320_v63 = vadd.f32 %v2739_v24, %v319_v62 }
 0xb3e   :  { %v653_v23 = vpop.permute.xlu1 %652 }
 0xb3f   :  { %v655_v5 = vmul.f32 %v653_v23, %v650_v22 }
 0xb41   :  { %v657_v6 = vadd.f32 %v656_v25, %v655_v5  ;;  %v146_v25 = vld [vmem:[%s2512_s5 + $0x38] sm:$0xff]  ;;  %s3109_s5 = sld [smem:[#allocation10_spill]] }
 0xb42   :  { %v158_v5 = vmul.f32 %v2683_v3, %v146_v25 }
 0xb43   :  { %659 = vrot.lane.b32.xlu2 %v657_v6, %s2497_s9 }
 0xb9d   :  { %v660_v8 = vpop.permute.xlu2 %659 }
 0xb9e   :  { %2201 = vmatmul.msk.f32.vlgmr.msra.gmra.mxu3 %vm259_vm1, %v660_v8 }
 0xc21   :  { %v680_v26 = vpop.f32.mrf.mxu3 }
 0xc22   :  { %v703_v12 = vadd.f32 %v680_v26, %v2734_v21  ;;  %v683_v29 = vadd.f32 %v680_v26, %v317_v28 }
 0xc24   :  { %705 = vrot.lane.b32.xlu0 %v703_v12, %s2495_s0  ;;  %v2202_v30 = vmul.f32 -1.442695, %v683_v29 }
 0xc26   :  { %2350 = vpow2.f32 %v2202_v30 }
 0xc2c   :  { %v2351_v31 = vpop.eup %2350 }
 0xc2d   :  { %v687_v32 = vadd.f32 1.0, %v2351_v31 }
 0xc2f   :  { %2352 = vrcp.f32 %v687_v32  ;;  %v699_v38 = vand.u32 2147483648, %v687_v32  ;;  %vm693_vm9 = vweird.f32 %v687_v32  ;;  %v697_v39 = vand.u32 2147483647, %v687_v32 }
 0xc31   :  { %v700_v41 = vor.u32 1.1754944e-38, %v699_v38  ;;  %vm698_vm11 = vcmp.eq.f32.partialorder %v697_v39, 8.507059e+37 }
 0xc35   :  { %v2353_v33 = vpop.eup %2352 }
 0xc36   :  { %v689_v34 = vmul.f32 %v2353_v33, %v687_v32  ;;  %vm694_vm8 = vweird.f32 %v2353_v33 }
 0xc37   :  { %vm695_vm10 = vmor %vm693_vm9, %vm694_vm8  ;;  %vm999_vm8 = vcmask 64512   ;;  %vm1055_vm9 = vcmask 1044480  }
 0xc38   :  { %v690_v35 = vsub.f32 1.0, %v689_v34 }
 0xc3a   :  { %v691_v36 = vmul.f32 %v2353_v33, %v690_v35 }
 0xc3c   :  { %v692_v37 = vadd.f32 %v2353_v33, %v691_v36 }
 0xc3e   :  { %v696_v40 = vsel %vm695_vm10, %v2353_v33, %v692_v37  ;;  %vm1417_vm10 = vcmask 1042432  }
 0xc3f   :  { %v701_v43 = vsel %vm698_vm11, %v700_v41, %v696_v40  ;;  %vm1026_vm11 = vcmask 36864  }
 0xc40   :  { %v715_v51 = vsub.f32 1.0, %v701_v43  ;;  %v721_v53 = vmul.f32 %v701_v43, %v657_v6  ;;  %v170_v6 = vadd.f32 %v2686_v4, %v158_v5 }
 0xc42   :  { %2183 = vmatmul.msk.f32.gmra.mxu0 %vm177_vm0, %v170_v6 }
 0xc96   :  { %v706_v42 = vpop.permute.xlu0 %705 }
 0xc97   :  { %v708_v44 = vmul.f32 %v706_v42, %v701_v43 }
 0xc99   :  { %710 = vrot.lane.b32.xlu1 %v708_v44, %s2495_s0 }
 0xcbf   :  { %v240_v27 = vpop.f32.mrf.mxu0 }
 0xd0b   :  { %v711_v48 = vpop.permute.xlu1 %710 }
 0xd0c   :  { %v713_v49 = vadd.f32 %v711_v48, %v317_v28  ;;  %v241_v28 = vadd.f32 %v2730_v17, %v240_v27 }
 0xd0e   :  { %2354 = vtanh.f32 %v713_v49  ;;  %v250_v29 = vmax.f32 %v241_v28, 0.0 }
 0xd10   :  { %2191 = vmatmul.msk.f32.gmra.mxu1 %vm259_vm1, %v250_v29 }
 0xd14   :  { %v2355_v50 = vpop.eup %2354 }
 0xd15   :  { %717 = vrot.lane.b32.xlu2 %v2355_v50, %s2497_s9 }
 0xd6f   :  { %v718_v52 = vpop.permute.xlu2 %717 }
 0xd70   :  { %v720_v54 = vmul.f32 %v718_v52, %v715_v51 }
 0xd72   :  { %v722_v55 = vadd.f32 %v721_v53, %v720_v54  ;;  %v856_v54 = vld [vmem:[%s2557_s14 + $0x18] sm:$0xff] }
 0xd73   :  { %878 = vmatpush.msra.mxu2 %v856_v54 }
 0xd74   :  { %724 = vrot.lane.b32.xlu0 %v722_v55, %s2497_s9 }
 0xd8d   :  { %v322_v36 = vpop.f32.mrf.mxu1 }
 0xd8e   :  { %v323_v17 = vadd.f32 %v2739_v24, %v322_v36 }
 0xde6   :  { %v725_v59 = vpop.permute.xlu0 %724 }
 0xde7   :  { %2203 = vmatmul.msk.f32.vlgmr.msrb.gmra.mxu2 %vm259_vm1, %v725_v59 }
 0xe6a   :  { %v745_v60 = vpop.f32.mrf.mxu2 }
 0xe6b   :  { %v768_v61 = vadd.f32 %v745_v60, %v2734_v21  ;;  %v748_v0 = vadd.f32 %v745_v60, %v320_v63 }
 0xe6d   :  { %770 = vrot.lane.b32.xlu1 %v768_v61, %s2495_s0  ;;  %v2204_v1 = vmul.f32 -1.442695, %v748_v0  ;;  %v887_v0 = vld [vmem:[%s2567_s24] sm:$0x1] }
 0xe6e   :  { %889 = vst.msk [vmem:[#allocation2] sm:$0x1] %vm888_vm5, %v887_v0 }
 0xe6f   :  { %2356 = vpow2.f32 %v2204_v1  ;;  %v892_v1 = vld [vmem:[%s2567_s24] sm:$0x1]  ;;  %s3115_s24 = sld [smem:[#allocation18_spill]] }
 0xe70   :  { %893 = vst.msk [vmem:[#allocation2 + $0x5] sm:$0x1] %vm888_vm5, %v892_v1 }
 0xe75   :  { %v2357_v2 = vpop.eup %2356 }
 0xe76   :  { %v752_v7 = vadd.f32 1.0, %v2357_v2  ;;  %v901_v2 = vld [vmem:[%s2572_s30 + $0x18] sm:$0xff] }
 0xe77   :  { %924 = vmatpush.msra.mxu3 %v901_v2 }
 0xe78   :  { %2358 = vrcp.f32 %v752_v7  ;;  %v764_v15 = vand.u32 2147483648, %v752_v7  ;;  %vm758_vm13 = vweird.f32 %v752_v7  ;;  %v762_v16 = vand.u32 2147483647, %v752_v7 }
 0xe7a   :  { %v765_v19 = vor.u32 1.1754944e-38, %v764_v15  ;;  %vm763_vm15 = vcmp.eq.f32.partialorder %v762_v16, 8.507059e+37  ;;  %v937_v15 = vld [vmem:[%s2582_s12] sm:$0xff]  ;;  %v971_v16 = vld [vmem:[%s2592_s27 + $0x18] sm:$0xff] }
 0xe7e   :  { %v2359_v9 = vpop.eup %2358 }
 0xe7f   :  { %v754_v10 = vmul.f32 %v2359_v9, %v752_v7  ;;  %vm759_vm12 = vweird.f32 %v2359_v9  ;;  %v940_v7 = vld [vmem:[%s2582_s12 + $0x18] sm:$0xff] }
 0xe80   :  { %vm760_vm14 = vmor %vm758_vm13, %vm759_vm12 }
 0xe81   :  { %v755_v11 = vsub.f32 1.0, %v754_v10  ;;  %v939_v10 = vld [vmem:[%s2582_s12 + $0x10] sm:$0xff] }
 0xe83   :  { %v756_v13 = vmul.f32 %v2359_v9, %v755_v11  ;;  %v899_v11 = vld [vmem:[%s2572_s30 + $0x8] sm:$0xff] }
 0xe85   :  { %v757_v14 = vadd.f32 %v2359_v9, %v756_v13  ;;  %v938_v13 = vld [vmem:[%s2582_s12 + $0x8] sm:$0xff]  ;;  %s3117_s12 = sld [smem:[#allocation16_spill]] }
 0xe87   :  { %v761_v18 = vsel %vm760_vm14, %v2359_v9, %v757_v14  ;;  %v900_v9 = vld [vmem:[%s2572_s30 + $0x10] sm:$0xff]  ;;  %v898_v14 = vld [vmem:[%s2572_s30] sm:$0xff]  ;;  %s3116_s30 = sld [smem:[#allocation20_spill]] }
 0xe88   :  { %v766_v22 = vsel %vm763_vm15, %v765_v19, %v761_v18  ;;  %925 = vmatpush.msra.mxu3 %v900_v9  ;;  %v970_v18 = vld [vmem:[%s2592_s27 + $0x10] sm:$0xff]  ;;  %v969_v19 = vld [vmem:[%s2592_s27 + $0x8] sm:$0xff] }
 0xe89   :  { %v780_v30 = vsub.f32 1.0, %v766_v22  ;;  %v786_v32 = vmul.f32 %v766_v22, %v722_v55  ;;  %v855_v55 = vld [vmem:[%s2557_s14 + $0x10] sm:$0xff]  ;;  %s3114_s14 = sld [smem:[#allocation15_spill]] }
 0xe8a   :  { %879 = vmatpush.msra.mxu2 %v855_v55  ;;  %926 = vmatpush.msra.mxu3 %v899_v11 }
 0xe8c   :  { %880 = vmatpush.msra.mxu2 %v854_v56  ;;  %927 = vmatpush.msra.mxu3 %v898_v14 }
 0xe8e   :  { %881 = vmatpush.msra.mxu2 %v853_v57 }
 0xe90   :  { %957 = vmatpush.msrb.mxu2 %v940_v7 }
 0xe92   :  { %958 = vmatpush.msrb.mxu2 %v939_v10 }
 0xe94   :  { %959 = vmatpush.msrb.mxu2 %v938_v13 }
 0xe96   :  { %960 = vmatpush.msrb.mxu2 %v937_v15 }
 0xedf   :  { %v771_v20 = vpop.permute.xlu1 %770 }
 0xee0   :  { %v773_v23 = vmul.f32 %v771_v20, %v766_v22  ;;  %v968_v20 = vld [vmem:[%s2592_s27] sm:$0xff]  ;;  %s3118_s27 = sld [smem:[#allocation17_spill]] }
 0xee1   :  { %v2307_v22 = vld [vmem:[%s3109_s5] ss:$0 sm:$0xff] }
 0xee2   :  { %775 = vrot.lane.b32.xlu2 %v773_v23, %s2495_s0 }
 0xf3c   :  { %v776_v8 = vpop.permute.xlu2 %775 }
 0xf3d   :  { %v778_v26 = vadd.f32 %v776_v8, %v320_v63  ;;  %v2308_v8 = vld [vmem:[%s3110_s13] ss:$0 sm:$0xff] }
 0xf3f   :  { %2360 = vtanh.f32 %v778_v26  ;;  %v2887_v26 = vld [vmem:[%s3111_s17] ss:$0 sm:$0xff] }
 0xf45   :  { %v2361_v12 = vpop.eup %2360 }
 0xf46   :  { %782 = vrot.lane.b32.xlu0 %v2361_v12, %s2497_s9 }
 0xfb8   :  { %v783_v31 = vpop.permute.xlu0 %782 }
 0xfb9   :  { %v785_v3 = vmul.f32 %v783_v31, %v780_v30 }
 0xfbb   :  { %v787_v33 = vadd.f32 %v786_v32, %v785_v3  ;;  %v2310_v3 = vld [vmem:[%s3112_s21] ss:$0 sm:$0xff] }
 0xfbd   :  { %789 = vrot.lane.b32.xlu1 %v787_v33, %s2497_s9 }
0x102f   :  { %v790_v4 = vpop.permute.xlu1 %789 }
0x1030   :  { %2205 = vmatmul.msk.f32.vlgmr.msrb.gmra.mxu3 %vm259_vm1, %v790_v4 }
0x1031   :  { %988 = vmatpush.msrb.mxu3 %v971_v16 }
0x1033   :  { %989 = vmatpush.msrb.mxu3 %v970_v18 }
0x1035   :  { %990 = vmatpush.msrb.mxu3 %v969_v19 }
0x1037   :  { %991 = vmatpush.msrb.mxu3 %v968_v20 }
0x10b3   :  { %v810_v34 = vpop.f32.mrf.mxu3 }
0x10b4   :  { %v833_v35 = vadd.f32 %v810_v34, %v2734_v21  ;;  %v813_v37 = vadd.f32 %v810_v34, %v323_v17 }
0x10b6   :  { %835 = vrot.lane.b32.xlu2 %v833_v35, %s2495_s0  ;;  %v2206_v38 = vmul.f32 -1.442695, %v813_v37 }
0x10b8   :  { %2362 = vpow2.f32 %v2206_v38 }
0x10be   :  { %v2363_v39 = vpop.eup %2362 }
0x10bf   :  { %v817_v40 = vadd.f32 1.0, %v2363_v39 }
0x10c1   :  { %2364 = vrcp.f32 %v817_v40  ;;  %v829_v46 = vand.u32 2147483648, %v817_v40  ;;  %vm823_vm2 = vweird.f32 %v817_v40  ;;  %v827_v21 = vand.u32 2147483647, %v817_v40 }
0x10c3   :  { %v830_v47 = vor.u32 1.1754944e-38, %v829_v46  ;;  %vm828_vm4 = vcmp.eq.f32.partialorder %v827_v21, 8.507059e+37 }
0x10c7   :  { %v2365_v41 = vpop.eup %2364 }
0x10c8   :  { %v819_v42 = vmul.f32 %v2365_v41, %v817_v40  ;;  %vm824_vm0 = vweird.f32 %v2365_v41 }
0x10c9   :  { %vm825_vm3 = vmor %vm823_vm2, %vm824_vm0  ;;  %vm1051_vm0 = vcmask 39936  }
0x10ca   :  { %v820_v43 = vsub.f32 1.0, %v819_v42 }
0x10cc   :  { %v821_v44 = vmul.f32 %v2365_v41, %v820_v43 }
0x10ce   :  { %v822_v45 = vadd.f32 %v2365_v41, %v821_v44 }
0x10d0   :  { %v826_v24 = vsel %vm825_vm3, %v2365_v41, %v822_v45 }
0x10d1   :  { %v831_v49 = vsel %vm828_vm4, %v830_v47, %v826_v24 }
0x10d2   :  { %v845_v58 = vsub.f32 1.0, %v831_v49  ;;  %v851_v60 = vmul.f32 %v831_v49, %v787_v33 }
0x1110   :  { %v836_v48 = vpop.permute.xlu2 %835 }
0x1111   :  { %v838_v50 = vmul.f32 %v836_v48, %v831_v49 }
0x1113   :  { %840 = vrot.lane.b32.xlu0 %v838_v50, %s2495_s0 }
0x1185   :  { %v841_v51 = vpop.permute.xlu0 %840 }
0x1186   :  { %v843_v52 = vadd.f32 %v841_v51, %v323_v17 }
0x1188   :  { %2366 = vtanh.f32 %v843_v52 }
0x118e   :  { %v2367_v53 = vpop.eup %2366 }
0x118f   :  { %847 = vrot.lane.b32.xlu1 %v2367_v53, %s2497_s9 }
0x1201   :  { %v848_v59 = vpop.permute.xlu1 %847 }
0x1202   :  { %v850_v61 = vmul.f32 %v848_v59, %v845_v58 }
0x1204   :  { %v852_v62 = vadd.f32 %v851_v60, %v850_v61 }
0x1206   :  { %862 = vrot.lane.b32.xlu2 %v852_v62, %s2497_s9 }
0x1260   :  { %v863_v63 = vpop.permute.xlu2 %862 }
0x1261   :  { %2207 = vmatmul.msk.f32.vlgmr.msra.gmra.mxu2 %vm259_vm1, %v863_v63 }
0x12e4   :  { %v883_v23 = vpop.f32.mrf.mxu2 }
0x12e5   :  { %v884_v25 = vadd.f32 %v2307_v22, %v883_v23 }
0x12e7   :  { %891 = vst.msk [vmem:[#allocation2 + $0x1] sm:$0xf] %vm890_vm6, %v884_v25 }
0x12e8   :  { %895 = vst.msk [vmem:[#allocation2 + $0x2] sm:$0xf0] %vm894_vm7, %v884_v25 }
0x12e9   :  { %886 = vst.msk [vmem:[#allocation6] sm:$0xff] %vm259_vm1, %v884_v25 }
0x12ef   :  { %v2869_v5 = vld [vmem:[#allocation2] sm:$0xff]  ;;  %v2875_v6 = vld [vmem:[#allocation2 + $0x8] sm:$0x3] }
0x12f0   :  { %2208 = vmatmul.msk.f32.vlgmr.msra.gmra.mxu3 %vm259_vm1, %v2869_v5  ;;  %2210 = vmatmul.msk.f32.vlgmr.msrb.gmra.mxu2 %vm259_vm1, %v2869_v5 }
0x12f8   :  { %2209 = vmatmul.msk.f32.gmra.mxu3 %vm259_vm1, %v2875_v6  ;;  %2211 = vmatmul.msk.f32.gmra.mxu2 %vm259_vm1, %v2875_v6 }
0x1300   :  { %2212 = vmatmul.msk.f32.vlgmr.msrb.gmra.mxu3 %vm259_vm1, %v2869_v5 }
0x1308   :  { %2213 = vmatmul.msk.f32.gmra.mxu3 %vm259_vm1, %v2875_v6 }
0x1373   :  { %v929_v12 = vpop.f32.mrf.mxu3  ;;  %v962_v27 = vpop.f32.mrf.mxu2 }
0x1374   :  { %v930_v28 = vadd.f32 %v2308_v8, %v929_v12  ;;  %v2890_v29 = vadd.f32 %v2887_v26, %v962_v27 }
0x1376   :  { %v2892_v30 = vmul.f32 0.35355338, %v930_v28  ;;  %1208 = vrot.lane.b32.xlu2 %v2890_v29, %s2498_s25  ;;  %1082 = vrot.lane.b32.xlu0 %v2890_v29, %s2499_s29 }
0x1377   :  { %2214 = vmatpush.xpose.msk.msra.mxu2 %vm999_vm8, %v2890_v29 }
0x1378   :  { %1080 = vrot.lane.b32.xlu1 %v2892_v30, %s2499_s29 }
0x137a   :  { %2215 = vmatmul.msk.f32.vlgmr.msra.gmra.mxu2 %vm999_vm8, %v2892_v30 }
0x137b   :  { %v932_v31 = vpop.f32.mrf.mxu3  ;;  %v2927_v48 = vpop.f32.mrf.mxu2 }
0x137c   :  { %v2904_v32 = vadd.f32 %v2308_v8, %v932_v31 }
0x137e   :  { %1206 = vrot.lane.b32.xlu0 %v2892_v30, %s2498_s25 }
0x1383   :  { %v993_v33 = vpop.f32.mrf.mxu3 }
0x1384   :  { %v2909_v4 = vadd.f32 %v2310_v3, %v993_v33 }
0x1386   :  { %2216 = vmatpush.msk.msrb.mxu0 %vm1055_vm9, %v2909_v4  ;;  %v1474_v36 = vrot.slane %v2909_v4, 5 }
0x138b   :  { %v996_v34 = vpop.f32.mrf.mxu3 }
0x138c   :  { %v997_v35 = vadd.f32 %v2310_v3, %v996_v34  ;;  %v1159_v34 = vld [vmem:[%s3113_s8 + $0x8] sm:$0xff] }
0x138d   :  { %1178 = vmatpush.msra.mxu3 %v1159_v34 }
0x138e   :  { %v1475_v17 = vrot.slane %v997_v35, 5  ;;  %v1285_v35 = vld [vmem:[%s3113_s8 + $0x10] sm:$0xff] }
0x138f   :  { %1304 = vmatpush.msrb.mxu3 %v1285_v35 }
0x1390   :  { %v2915_v37 = vsel %vm1417_vm10, %v1474_v36, %v1475_v17  ;;  %v1079_v36 = vld [vmem:[%s3113_s8] sm:$0xff] }
0x1391   :  { %1201 = vmatpush.msra.mxu0 %v1079_v36 }
0x13d0   :  { %v1209_v39 = vpop.permute.xlu2 %1208 }
0x13e8   :  { %v1083_v38 = vpop.permute.xlu0 %1082 }
0x13e9   :  { %2218 = vmatpush.xpose.msk.msrb.mxu1 %vm999_vm8, %v1083_v38 }
0x13ea   :  { %v1081_v40 = vpop.permute.xlu1 %1080 }
0x13ec   :  { %2219 = vmatmul.msk.f32.vlgmr.msrb.gmra.mxu1 %vm999_vm8, %v1081_v40 }
0x13ed   :  { %2224 = vmatpush.xpose.msk.msra.mxu1 %vm999_vm8, %v1209_v39  ;;  %v966_v39 = vadd.f32 %v2887_v26, %v2927_v48 }
0x13f0   :  { %v1207_v41 = vpop.permute.xlu0 %1206 }
0x13f4   :  { %2225 = vmatmul.msk.f32.vlgmr.msra.gmra.mxu1 %vm999_vm8, %v1207_v41 }
0x13fd   :  { %v1023_v53 = vpop.f32.mrf.mxu2 }
0x13fe   :  { %v1027_v56 = vsel %vm1026_vm11, %v1023_v53, -inf }
0x1469   :  { %v1105_v42 = vpop.f32.mrf.mxu1 }
0x146a   :  { %v1108_v43 = vsel %vm1026_vm11, %v1105_v42, -inf }
0x146b   :  { %1109 = vmax.xlane.f32.xlu1 %v1108_v43 }
0x1471   :  { %v1231_v44 = vpop.f32.mrf.mxu1 }
0x1472   :  { %v1234_v45 = vsel %vm1026_vm11, %v1231_v44, -inf }
0x1473   :  { %1235 = vmax.xlane.f32.xlu2 %v1234_v45 }
0x1484   :  { %1132 = vrot.lane.b32.xlu1 %v2909_v4, %s2499_s29 }
0x148c   :  { %1310 = vrot.lane.b32.xlu1 %v2892_v30, %s2500_s3 }
0x14de   :  { %v1110_v46 = vpop.xlane.xlu1 %1109 }
0x14df   :  { %v1111_v21 = vsub.f32 %v1105_v42, %v1110_v46  ;;  %v1423_v42 = vrot.slane %v966_v39, 5  ;;  %v1422_v46 = vrot.slane %v2890_v29, 5 }
0x14e1   :  { %v1112_v24 = vmul.f32 1.442695, %v1111_v21 }
0x14e3   :  { %2368 = vpow2.f32 %v1112_v24 }
0x14e6   :  { %v1236_v47 = vpop.xlane.xlu2 %1235 }
0x14e7   :  { %v1237_v49 = vsub.f32 %v1231_v44, %v1236_v47  ;;  %v2948_v47 = vsel %vm1417_vm10, %v1422_v46, %v1423_v42 }
0x14e9   :  { %v2369_v50 = vpop.eup %2368  ;;  %v1238_v51 = vmul.f32 1.442695, %v1237_v49 }
0x14ea   :  { %v1114_v52 = vsel %vm1026_vm11, %v2369_v50, 0.0 }
0x14eb   :  { %2370 = vpow2.f32 %v1238_v51  ;;  %1115 = vadd.xlane.f32.xlu0 %v1114_v52 }
0x14f1   :  { %v2371_v54 = vpop.eup %2370 }
0x14f2   :  { %v1240_v55 = vsel %vm1026_vm11, %v2371_v54, 0.0 }
0x14f3   :  { %1241 = vadd.xlane.f32.xlu2 %v1240_v55  ;;  %1028 = vmax.xlane.f32.xlu0 %v1027_v56 }
0x14f6   :  { %v1133_v57 = vpop.permute.xlu1 %1132 }
0x14f7   :  { %2220 = vmatpush.msk.msrb.mxu2 %vm1055_vm9, %v1133_v57 }
0x150b   :  { %1258 = vrot.lane.b32.xlu2 %v2909_v4, %s2498_s25 }
0x155e   :  { %v1116_v58 = vpop.xlane.xlu0 %1115 }
0x155f   :  { %2372 = vrcp.f32 %v1116_v58  ;;  %v1128_v1 = vand.u32 2147483648, %v1116_v58  ;;  %v1126_v7 = vand.u32 2147483647, %v1116_v58  ;;  %vm1122_vm13 = vweird.f32 %v1116_v58 }
0x1561   :  { %v1129_v13 = vor.u32 1.1754944e-38, %v1128_v1  ;;  %vm1127_vm15 = vcmp.eq.f32.partialorder %v1126_v7, 8.507059e+37 }
0x1565   :  { %v2373_v59 = vpop.eup %2372 }
0x1566   :  { %v1118_v60 = vmul.f32 %v2373_v59, %v1116_v58  ;;  %v1242_v61 = vpop.xlane.xlu2 %1241  ;;  %v1029_v62 = vpop.xlane.xlu0 %1028  ;;  %vm1123_vm12 = vweird.f32 %v2373_v59 }
0x1567   :  { %2374 = vrcp.f32 %v1242_v61  ;;  %v1030_v0 = vsub.f32 %v1023_v53, %v1029_v62  ;;  %vm1124_vm14 = vmor %vm1122_vm13, %vm1123_vm12  ;;  %v1254_v22 = vand.u32 2147483648, %v1242_v61  ;;  %v1252_v8 = vand.u32 2147483647, %v1242_v61 }
0x1568   :  { %v1119_v63 = vsub.f32 1.0, %v1118_v60  ;;  %vm1248_vm3 = vweird.f32 %v1242_v61 }
0x1569   :  { %v1031_v9 = vmul.f32 1.442695, %v1030_v0  ;;  %v1255_v28 = vor.u32 1.1754944e-38, %v1254_v22  ;;  %vm1253_vm5 = vcmp.eq.f32.partialorder %v1252_v8, 8.507059e+37 }
0x156a   :  { %v1120_v2 = vmul.f32 %v2373_v59, %v1119_v63 }
0x156b   :  { %2376 = vpow2.f32 %v1031_v9 }
0x156c   :  { %v1121_v10 = vadd.f32 %v2373_v59, %v1120_v2 }
0x156d   :  { %v2375_v11 = vpop.eup %2374 }
0x156e   :  { %v1125_v14 = vsel %vm1124_vm14, %v2373_v59, %v1121_v10  ;;  %v1244_v15 = vmul.f32 %v2375_v11, %v1242_v61  ;;  %v1259_v16 = vpop.permute.xlu2 %1258  ;;  %vm1249_vm2 = vweird.f32 %v2375_v11 }
0x156f   :  { %v1130_v18 = vsel %vm1127_vm15, %v1129_v13, %v1125_v14  ;;  %2226 = vmatpush.msk.msra.mxu2 %vm1055_vm9, %v1259_v16  ;;  %vm1250_vm4 = vmor %vm1248_vm3, %vm1249_vm2 }
0x1570   :  { %v1245_v19 = vsub.f32 1.0, %v1244_v15  ;;  %v1131_v20 = vmul.f32 %v2369_v50, %v1130_v18 }
0x1571   :  { %v2377_v23 = vpop.eup %2376 }
0x1572   :  { %v1246_v25 = vmul.f32 %v2375_v11, %v1245_v19  ;;  %2221 = vmatmul.msk.f32.vlgmr.msrb.gmra.mxu2 %vm1051_vm0, %v1131_v20  ;;  %v1033_v12 = vsel %vm1026_vm11, %v2377_v23, 0.0 }
0x1573   :  { %1034 = vadd.xlane.f32.xlu0 %v1033_v12 }
0x1574   :  { %v1247_v27 = vadd.f32 %v2375_v11, %v1246_v25 }
0x1576   :  { %v1251_v31 = vsel %vm1250_vm4, %v2375_v11, %v1247_v27 }
0x1577   :  { %v1256_v3 = vsel %vm1253_vm5, %v1255_v28, %v1251_v31 }
0x1578   :  { %v1257_v33 = vmul.f32 %v2371_v54, %v1256_v3  ;;  %v1418_v54 = vrot.slane %v2892_v30, 5 }
0x157a   :  { %2227 = vmatmul.msk.f32.vlgmr.msra.gmra.mxu2 %vm1051_vm0, %v1257_v33 }
0x1587   :  { %1312 = vrot.lane.b32.xlu0 %v2890_v29, %s2500_s3  ;;  %v936_v29 = vmul.f32 0.35355338, %v2904_v32  ;;  %v1311_v32 = vpop.permute.xlu1 %1310 }
0x1589   :  { %v1419_v53 = vrot.slane %v936_v29, 5 }
0x158b   :  { %v1420_v55 = vsel %vm1417_vm10, %v1418_v54, %v1419_v53 }
0x15e6   :  { %v1035_v17 = vpop.xlane.xlu0 %1034 }
0x15e7   :  { %2378 = vrcp.f32 %v1035_v17  ;;  %v1047_v43 = vand.u32 2147483648, %v1035_v17  ;;  %v1045_v45 = vand.u32 2147483647, %v1035_v17  ;;  %vm1041_vm7 = vweird.f32 %v1035_v17 }
0x15e9   :  { %v1048_v49 = vor.u32 1.1754944e-38, %v1047_v43  ;;  %vm1046_vm13 = vcmp.eq.f32.partialorder %v1045_v45, 8.507059e+37 }
0x15ed   :  { %v2379_v38 = vpop.eup %2378 }
0x15ee   :  { %v1037_v40 = vmul.f32 %v2379_v38, %v1035_v17  ;;  %vm1042_vm6 = vweird.f32 %v2379_v38 }
0x15ef   :  { %vm1043_vm12 = vmor %vm1041_vm7, %vm1042_vm6  ;;  %vm1414_vm7 = vcmask 258048  }
0x15f0   :  { %v1038_v41 = vsub.f32 1.0, %v1037_v40 }
0x15f2   :  { %v1039_v44 = vmul.f32 %v2379_v38, %v1038_v41 }
0x15f4   :  { %v1040_v21 = vadd.f32 %v2379_v38, %v1039_v44 }
0x15f5   :  { %v1156_v24 = vpop.f32.mrf.mxu2 }
0x15f6   :  { %2222 = vmatmul.msk.f32.vlgmr.msra.gmra.mxu3 %vm999_vm8, %v1156_v24  ;;  %v1044_v26 = vsel %vm1043_vm12, %v2379_v38, %v1040_v21 }
0x15f7   :  { %2234 = vmatpush.xpose.msk.msra.mxu3 %vm999_vm8, %v2948_v47  ;;  %v1049_v48 = vsel %vm1046_vm13, %v1048_v49, %v1044_v26  ;;  %v2996_v49 = vld [vmem:[%s3113_s8 + $0x18] sm:$0xff] }
0x15f8   :  { %v1050_v50 = vmul.f32 %v2377_v23, %v1049_v48  ;;  %1408 = vmatpush.msrb.mxu2 %v2996_v49 }
0x15f9   :  { %v1313_v51 = vpop.permute.xlu0 %1312 }
0x15fa   :  { %2217 = vmatmul.msk.f32.vlgmr.msrb.gmra.mxu0 %vm1051_vm0, %v1050_v50 }
0x15fb   :  { %2229 = vmatpush.xpose.msk.msrb.mxu0 %vm999_vm8, %v1313_v51 }
0x15fd   :  { %v1282_v52 = vpop.f32.mrf.mxu2 }
0x15fe   :  { %2228 = vmatmul.msk.f32.vlgmr.msrb.gmra.mxu3 %vm999_vm8, %v1282_v52 }
0x15ff   :  { %1601 = vmatpush.msrb.mxu3 %v1159_v34 }
0x1606   :  { %2235 = vmatmul.msk.f32.vlgmr.msra.gmra.mxu3 %vm999_vm8, %v1420_v55 }
0x1607   :  { %1727 = vmatpush.msra.mxu3 %v1285_v35 }
0x1677   :  { %v1076_v56 = vpop.f32.mrf.mxu0 }
0x1678   :  { %2223 = vmatmul.msk.f32.vlgmr.msra.gmra.mxu0 %vm999_vm8, %v1076_v56 }
0x1679   :  { %v2961_v57 = vpop.f32.mrf.mxu3  ;;  %2236 = vmatpush.msk.msra.mxu0 %vm1055_vm9, %v2915_v37 }
0x1680   :  { %2230 = vmatmul.msk.f32.vlgmr.msrb.gmra.mxu0 %vm999_vm8, %v1311_v32 }
0x1681   :  { %v2966_v58 = vpop.f32.mrf.mxu3  ;;  %1624 = vmatpush.msrb.mxu0 %v1079_v36 }
0x1689   :  { %v1446_v30 = vpop.f32.mrf.mxu3 }
0x168a   :  { %v1449_v59 = vsel %vm1026_vm11, %v1446_v30, -inf }
0x168b   :  { %1450 = vmax.xlane.f32.xlu2 %v1449_v59 }
0x16f5   :  { %v2969_v60 = vpop.f32.mrf.mxu0 }
0x16f6   :  { %v1204_v32 = vadd.f32 %v2969_v60, %v2961_v57 }
0x16f8   :  { %v1309_v59 = vadd.f32 %v2966_v58, %v1204_v32 }
0x16fd   :  { %v1335_v61 = vpop.f32.mrf.mxu0 }
0x16fe   :  { %v1451_v62 = vpop.xlane.xlu2 %1450  ;;  %v1338_v0 = vsel %vm1026_vm11, %v1335_v61, -inf }
0x16ff   :  { %v1452_v63 = vsub.f32 %v1446_v30, %v1451_v62  ;;  %1339 = vmax.xlane.f32.xlu0 %v1338_v0 }
0x1701   :  { %v1453_v1 = vmul.f32 1.442695, %v1452_v63 }
0x1703   :  { %2380 = vpow2.f32 %v1453_v1 }
0x1709   :  { %v2381_v2 = vpop.eup %2380 }
0x170a   :  { %v1455_v7 = vsel %vm1026_vm11, %v2381_v2, 0.0 }
0x170b   :  { %1456 = vadd.xlane.f32.xlu1 %v1455_v7 }
0x1713   :  { %1503 = vrot.lane.b32.xlu0 %v1420_v55, %s2499_s29 }
0x171b   :  { %1735 = vrot.lane.b32.xlu0 %v2948_v47, %s2500_s3 }
0x1724   :  { %1362 = vrot.lane.b32.xlu1 %v2909_v4, %s2500_s3 }
0x172c   :  { %1631 = vrot.lane.b32.xlu1 %v2948_v47, %s2498_s25 }
0x1734   :  { %1733 = vrot.lane.b32.xlu1 %v1420_v55, %s2500_s3 }
0x1772   :  { %v1340_v9 = vpop.xlane.xlu0 %1339 }
0x1773   :  { %v1341_v10 = vsub.f32 %v1335_v61, %v1340_v9 }
0x1775   :  { %v1342_v11 = vmul.f32 1.442695, %v1341_v10 }
0x1777   :  { %2382 = vpow2.f32 %v1342_v11 }
0x177d   :  { %v2383_v13 = vpop.eup %2382 }
0x177e   :  { %v1457_v14 = vpop.xlane.xlu1 %1456  ;;  %v1344_v15 = vsel %vm1026_vm11, %v2383_v13, 0.0 }
0x177f   :  { %2384 = vrcp.f32 %v1457_v14  ;;  %1345 = vadd.xlane.f32.xlu2 %v1344_v15  ;;  %v1469_v4 = vand.u32 2147483648, %v1457_v14  ;;  %v1467_v23 = vand.u32 2147483647, %v1457_v14  ;;  %vm1463_vm14 = vweird.f32 %v1457_v14 }
0x1781   :  { %v1470_v8 = vor.u32 1.1754944e-38, %v1469_v4  ;;  %vm1468_vm2 = vcmp.eq.f32.partialorder %v1467_v23, 8.507059e+37 }
0x1785   :  { %v2385_v16 = vpop.eup %2384  ;;  %v1504_v20 = vpop.permute.xlu0 %1503 }
0x1786   :  { %v1459_v18 = vmul.f32 %v2385_v16, %v1457_v14  ;;  %vm1464_vm10 = vweird.f32 %v2385_v16 }
0x1787   :  { %vm1465_vm15 = vmor %vm1463_vm14, %vm1464_vm10 }
0x1788   :  { %v1460_v19 = vsub.f32 1.0, %v1459_v18 }
0x178a   :  { %v1461_v22 = vmul.f32 %v2385_v16, %v1460_v19 }
0x178c   :  { %v1462_v25 = vadd.f32 %v2385_v16, %v1461_v22 }
0x178d   :  { %v1736_v31 = vpop.permute.xlu0 %1735 }
0x178e   :  { %v1466_v12 = vsel %vm1465_vm15, %v2385_v16, %v1462_v25 }
0x178f   :  { %v1471_v27 = vsel %vm1468_vm2, %v1470_v8, %v1466_v12 }
0x1790   :  { %v1472_v28 = vmul.f32 %v2381_v2, %v1471_v27 }
0x1792   :  { %2237 = vmatmul.msk.f32.vlgmr.msra.gmra.mxu0 %vm1051_vm0, %v1472_v28 }
0x1793   :  { %2249 = vmatpush.xpose.msk.msra.mxu0 %vm999_vm8, %v1736_v31 }
0x1796   :  { %v1363_v3 = vpop.permute.xlu1 %1362 }
0x1797   :  { %2231 = vmatpush.msk.msrb.mxu1 %vm1055_vm9, %v1363_v3  ;;  %1505 = vrot.lane.b32.xlu2 %v2948_v47, %s2499_s29 }
0x179e   :  { %v1632_v46 = vpop.permute.xlu1 %1631 }
0x179f   :  { %1629 = vrot.lane.b32.xlu2 %v1420_v55, %s2498_s25 }
0x17a6   :  { %v1734_v24 = vpop.permute.xlu1 %1733 }
0x17f2   :  { %v1346_v33 = vpop.xlane.xlu2 %1345 }
0x17f3   :  { %2386 = vrcp.f32 %v1346_v33  ;;  %v1358_v38 = vand.u32 2147483648, %v1346_v33  ;;  %v1356_v40 = vand.u32 2147483647, %v1346_v33  ;;  %vm1352_vm4 = vweird.f32 %v1346_v33 }
0x17f5   :  { %v1359_v42 = vor.u32 1.1754944e-38, %v1358_v38  ;;  %vm1357_vm6 = vcmp.eq.f32.partialorder %v1356_v40, 8.507059e+37 }
0x17f9   :  { %v2387_v34 = vpop.eup %2386 }
0x17fa   :  { %v1348_v35 = vmul.f32 %v2387_v34, %v1346_v33  ;;  %v1506_v36 = vpop.permute.xlu2 %1505  ;;  %vm1353_vm3 = vweird.f32 %v2387_v34 }
0x17fb   :  { %2238 = vmatpush.xpose.msk.msra.mxu1 %vm999_vm8, %v1506_v36  ;;  %vm1354_vm5 = vmor %vm1352_vm4, %vm1353_vm3 }
0x17fc   :  { %v1349_v17 = vsub.f32 1.0, %v1348_v35 }
0x17fe   :  { %v1350_v39 = vmul.f32 %v2387_v34, %v1349_v17 }
0x1800   :  { %v1351_v41 = vadd.f32 %v2387_v34, %v1350_v39 }
0x1802   :  { %v1355_v43 = vsel %vm1354_vm5, %v2387_v34, %v1351_v41  ;;  %v1630_v47 = vpop.permute.xlu2 %1629 }
0x1803   :  { %v1360_v44 = vsel %vm1357_vm6, %v1359_v42, %v1355_v43 }
0x1804   :  { %v1361_v45 = vmul.f32 %v2383_v13, %v1360_v44 }
0x1806   :  { %2232 = vmatmul.msk.f32.vlgmr.msrb.gmra.mxu1 %vm1051_vm0, %v1361_v45 }
0x1807   :  { %2244 = vmatpush.xpose.msk.msrb.mxu1 %vm999_vm8, %v1632_v46 }
0x180e   :  { %2239 = vmatmul.msk.f32.vlgmr.msra.gmra.mxu1 %vm999_vm8, %v1504_v20 }
0x180f   :  { %v1499_v21 = vpop.f32.mrf.mxu0 }
0x1810   :  { %2243 = vmatmul.msk.f32.vlgmr.msrb.gmra.mxu0 %vm999_vm8, %v1499_v21 }
0x1816   :  { %2245 = vmatmul.msk.f32.vlgmr.msrb.gmra.mxu1 %vm999_vm8, %v1630_v47 }
0x1818   :  { %2250 = vmatmul.msk.f32.vlgmr.msra.gmra.mxu0 %vm999_vm8, %v1734_v24 }
0x1883   :  { %v1386_v26 = vpop.f32.mrf.mxu1 }
0x1884   :  { %2233 = vmatmul.msk.f32.vlgmr.msrb.gmra.mxu2 %vm999_vm8, %v1386_v26 }
0x188b   :  { %v1528_v48 = vpop.f32.mrf.mxu1 }
0x188c   :  { %v1531_v51 = vsel %vm1026_vm11, %v1528_v48, -inf }
0x188d   :  { %v3000_v50 = vpop.f32.mrf.mxu0  ;;  %1532 = vmax.xlane.f32.xlu2 %v1531_v51 }
0x1893   :  { %v1654_v29 = vpop.f32.mrf.mxu1 }
0x1894   :  { %v1657_v53 = vsel %vm1026_vm11, %v1654_v29, -inf }
0x1895   :  { %v1758_v52 = vpop.f32.mrf.mxu0  ;;  %1658 = vmax.xlane.f32.xlu0 %v1657_v53 }
0x1896   :  { %v1761_v54 = vsel %vm1026_vm11, %v1758_v52, -inf }
0x1897   :  { %1762 = vmax.xlane.f32.xlu1 %v1761_v54 }
0x1900   :  { %v1533_v55 = vpop.xlane.xlu2 %1532 }
0x1901   :  { %v1534_v56 = vsub.f32 %v1528_v48, %v1533_v55 }
0x1903   :  { %v1535_v30 = vmul.f32 1.442695, %v1534_v56 }
0x1905   :  { %2388 = vpow2.f32 %v1535_v30 }
0x1907   :  { %v1410_v61 = vpop.f32.mrf.mxu2 }
0x1908   :  { %v1413_v62 = vadd.f32 %v1410_v61, %v1309_v59  ;;  %v1659_v63 = vpop.xlane.xlu0 %1658 }
0x1909   :  { %v1660_v1 = vsub.f32 %v1654_v29, %v1659_v63 }
0x190a   :  { %v1763_v0 = vpop.xlane.xlu1 %1762  ;;  %1415 = vst.msk [vmem:[#allocation3] sm:$0x1f] %vm1414_vm7, %v1413_v62  ;;  %v2311_v62 = vld [vmem:[%s3114_s14] ss:$0 sm:$0xff] }
0x190b   :  { %v1764_v2 = vsub.f32 %v1758_v52, %v1763_v0  ;;  %v2389_v7 = vpop.eup %2388  ;;  %v1661_v9 = vmul.f32 1.442695, %v1660_v1 }
0x190c   :  { %v1537_v11 = vsel %vm1026_vm11, %v2389_v7, 0.0 }
0x190d   :  { %v1765_v10 = vmul.f32 1.442695, %v1764_v2  ;;  %2390 = vpow2.f32 %v1661_v9  ;;  %1538 = vadd.xlane.f32.xlu2 %v1537_v11  ;;  %v2501_v11 = vmov 32.0  }
0x190f   :  { %2392 = vpow2.f32 %v1765_v10 }
0x1913   :  { %v2391_v57 = vpop.eup %2390 }
0x1914   :  { %v1663_v58 = vsel %vm1026_vm11, %v2391_v57, 0.0 }
0x1915   :  { %v3010_v60 = vpop.eup %2392  ;;  %1664 = vadd.xlane.f32.xlu0 %v1663_v58 }
0x1916   :  { %v1767_v13 = vsel %vm1026_vm11, %v3010_v60, 0.0 }
0x1917   :  { %1768 = vadd.xlane.f32.xlu1 %v1767_v13 }
0x1925   :  { %1555 = vrot.lane.b32.xlu2 %v2915_v37, %s2499_s29 }
0x1929   :  { %1681 = vrot.lane.b32.xlu0 %v2915_v37, %s2498_s25 }
0x1930   :  { %1785 = vrot.lane.b32.xlu1 %v2915_v37, %s2500_s3 }
0x1980   :  { %v1539_v14 = vpop.xlane.xlu2 %1538 }
0x1981   :  { %2394 = vrcp.f32 %v1539_v14  ;;  %v1551_v22 = vand.u32 2147483648, %v1539_v14  ;;  %v1549_v25 = vand.u32 2147483647, %v1539_v14  ;;  %vm1545_vm12 = vweird.f32 %v1539_v14 }
0x1983   :  { %v1552_v37 = vor.u32 1.1754944e-38, %v1551_v22  ;;  %vm1550_vm10 = vcmp.eq.f32.partialorder %v1549_v25, 8.507059e+37 }
0x1987   :  { %v2395_v15 = vpop.eup %2394 }
0x1988   :  { %v1541_v16 = vmul.f32 %v2395_v15, %v1539_v14  ;;  %v1556_v18 = vpop.permute.xlu2 %1555  ;;  %v1665_v19 = vpop.xlane.xlu0 %1664  ;;  %vm1546_vm11 = vweird.f32 %v2395_v15 }
0x1989   :  { %2396 = vrcp.f32 %v1665_v19  ;;  %2240 = vmatpush.msk.msra.mxu2 %vm1055_vm9, %v1556_v18  ;;  %vm1547_vm13 = vmor %vm1545_vm12, %vm1546_vm11  ;;  %v1677_v36 = vand.u32 2147483648, %v1665_v19  ;;  %v1675_v39 = vand.u32 2147483647, %v1665_v19  ;;  %vm1671_vm15 = vweird.f32 %v1665_v19 }
0x198a   :  { %v1769_v20 = vpop.xlane.xlu1 %1768  ;;  %v1542_v4 = vsub.f32 1.0, %v1541_v16 }
0x198b   :  { %2398 = vrcp.f32 %v1769_v20  ;;  %v1678_v42 = vor.u32 1.1754944e-38, %v1677_v36  ;;  %vm1676_vm4 = vcmp.eq.f32.partialorder %v1675_v39, 8.507059e+37  ;;  %v1781_v45 = vand.u32 2147483648, %v1769_v20 }
0x198c   :  { %v1543_v23 = vmul.f32 %v2395_v15, %v1542_v4  ;;  %vm1775_vm5 = vweird.f32 %v1769_v20  ;;  %v1779_v21 = vand.u32 2147483647, %v1769_v20  ;;  %2400 = vrcp.f32 %v2501_v11 }
0x198d   :  { %v1782_v48 = vor.u32 1.1754944e-38, %v1781_v45  ;;  %v2312_v45 = vld [vmem:[%s3117_s12] ss:$0 sm:$0xff] }
0x198e   :  { %v1544_v8 = vadd.f32 %v2395_v15, %v1543_v23  ;;  %vm1780_vm11 = vcmp.eq.f32.partialorder %v1779_v21, 8.507059e+37 }
0x198f   :  { %v2397_v12 = vpop.eup %2396 }
0x1990   :  { %v1548_v28 = vsel %vm1547_vm13, %v2395_v15, %v1544_v8  ;;  %v1667_v31 = vmul.f32 %v2397_v12, %v1665_v19  ;;  %vm1672_vm14 = vweird.f32 %v2397_v12  ;;  %v1915_v8 = vld [vmem:[%s3115_s24 + $0x18] sm:$0xff] }
0x1991   :  { %v2399_v27 = vpop.eup %2398  ;;  %v1553_v3 = vsel %vm1550_vm10, %v1552_v37, %v1548_v28  ;;  %vm1673_vm2 = vmor %vm1671_vm15, %vm1672_vm14  ;;  %v1913_v37 = vld [vmem:[%s3115_s24 + $0x8] sm:$0xff] }
0x1992   :  { %v1771_v33 = vmul.f32 %v2399_v27, %v1769_v20  ;;  %v1668_v34 = vsub.f32 1.0, %v1667_v31  ;;  %v1554_v35 = vmul.f32 %v2389_v7, %v1553_v3  ;;  %vm1776_vm3 = vweird.f32 %v2399_v27 }
0x1993   :  { %vm1777_vm6 = vmor %vm1775_vm5, %vm1776_vm3 }
0x1994   :  { %v1772_v17 = vsub.f32 1.0, %v1771_v33  ;;  %v1669_v38 = vmul.f32 %v2397_v12, %v1668_v34  ;;  %2241 = vmatmul.msk.f32.vlgmr.msra.gmra.mxu2 %vm1051_vm0, %v1554_v35  ;;  %v1954_v33 = vld [vmem:[%s3116_s30 + $0x18] sm:$0xff] }
0x1995   :  { %1977 = vmatpush.msrb.mxu0 %v1954_v33 }
0x1996   :  { %v1773_v40 = vmul.f32 %v2399_v27, %v1772_v17  ;;  %v1670_v41 = vadd.f32 %v2397_v12, %v1669_v38 }
0x1998   :  { %v1774_v43 = vadd.f32 %v2399_v27, %v1773_v40  ;;  %v1674_v44 = vsel %vm1673_vm2, %v2397_v12, %v1670_v41  ;;  %v1914_v12 = vld [vmem:[%s3115_s24 + $0x10] sm:$0xff] }
0x1999   :  { %v1679_v46 = vsel %vm1676_vm4, %v1678_v42, %v1674_v44 }
0x199a   :  { %v1680_v24 = vmul.f32 %v2391_v57, %v1679_v46  ;;  %v1778_v47 = vsel %vm1777_vm6, %v2399_v27, %v1774_v43  ;;  %v2401_v57 = vpop.eup %2400  ;;  %v1912_v27 = vld [vmem:[%s3115_s24] sm:$0xff] }
0x199b   :  { %v1682_v26 = vpop.permute.xlu0 %1681  ;;  %v1783_v51 = vsel %vm1780_vm11, %v1782_v48, %v1778_v47  ;;  %v2313_v47 = vld [vmem:[%s3118_s27] ss:$0 sm:$0xff] }
0x199c   :  { %2246 = vmatpush.msk.msrb.mxu2 %vm1055_vm9, %v1682_v26  ;;  %v1784_v52 = vmul.f32 %v3010_v60, %v1783_v51  ;;  %v1858_v60 = vmul.f32 32.0, %v2401_v57 }
0x199d   :  { %2247 = vmatmul.msk.f32.vlgmr.msrb.gmra.mxu2 %vm1051_vm0, %v1680_v24 }
0x199e   :  { %1831 = vmatpush.msra.mxu2 %v2996_v49  ;;  %v1859_v58 = vsub.f32 1.0, %v1858_v60 }
0x19a0   :  { %v1860_v13 = vmul.f32 %v2401_v57, %v1859_v58 }
0x19a2   :  { %v1786_v29 = vpop.permute.xlu1 %1785  ;;  %v1861_v14 = vadd.f32 %v2401_v57, %v1860_v13 }
0x19a3   :  { %2251 = vmatpush.msk.msra.mxu1 %vm1055_vm9, %v1786_v29  ;;  %vm1853_vm9 = vcmask 254976  }
0x19a4   :  { %2252 = vmatmul.msk.f32.vlgmr.msra.gmra.mxu1 %vm1051_vm0, %v1784_v52 }
0x1a17   :  { %v1579_v53 = vpop.f32.mrf.mxu2 }
0x1a18   :  { %2242 = vmatmul.msk.f32.vlgmr.msrb.gmra.mxu3 %vm999_vm8, %v1579_v53 }
0x1a19   :  { %1938 = vmatpush.msrb.mxu3 %v1915_v8  ;;  %v2316_v8 = vld [vmem:[%s3121_s11] ss:$0 sm:$0xff] }
0x1a1b   :  { %1939 = vmatpush.msrb.mxu3 %v1914_v12 }
0x1a1d   :  { %1940 = vmatpush.msrb.mxu3 %v1913_v37 }
0x1a1f   :  { %1941 = vmatpush.msrb.mxu3 %v1912_v27  ;;  %v2317_v27 = vld [vmem:[%s3122_s15] ss:$0 sm:$0xff] }
0x1a20   :  { %v1705_v54 = vpop.f32.mrf.mxu2 }
0x1a21   :  { %v1809_v55 = vpop.f32.mrf.mxu1  ;;  %2248 = vmatmul.msk.f32.vlgmr.msra.gmra.mxu3 %vm999_vm8, %v1705_v54 }
0x1a22   :  { %2253 = vmatmul.msk.f32.vlgmr.msra.gmra.mxu2 %vm999_vm8, %v1809_v55  ;;  %vm1862_vm8 = vweird.f32 %v2401_v57 }
0x1a23   :  { %v3039_v15 = vsel %vm1862_vm8, %v2401_v57, %v1861_v14 }
0x1a9b   :  { %v1603_v56 = vpop.f32.mrf.mxu3 }
0x1a9c   :  { %v1627_v49 = vadd.f32 %v3000_v50, %v1603_v56 }
0x1aa4   :  { %v1729_v32 = vpop.f32.mrf.mxu3 }
0x1aa5   :  { %v1833_v30 = vpop.f32.mrf.mxu2  ;;  %v1732_v59 = vadd.f32 %v1729_v32, %v1627_v49  ;;  %v1953_v49 = vld [vmem:[%s3116_s30 + $0x10] sm:$0xff]  ;;  %v1952_v32 = vld [vmem:[%s3116_s30 + $0x8] sm:$0xff] }
0x1aa6   :  { %1978 = vmatpush.msrb.mxu0 %v1953_v49 }
0x1aa7   :  { %v1836_v61 = vadd.f32 %v1833_v30, %v1732_v59  ;;  %v1951_v30 = vld [vmem:[%s3116_s30] sm:$0xff] }
0x1aa8   :  { %1979 = vmatpush.msrb.mxu0 %v1952_v32  ;;  %v2314_v59 = vld [vmem:[%s3119_s7] ss:$0 sm:$0xff] }
0x1aa9   :  { %1837 = vst.msk [vmem:[#allocation3 + $0x5] sm:$0x1f] %vm1414_vm7, %v1836_v61 }
0x1aaa   :  { %1980 = vmatpush.msrb.mxu0 %v1951_v30 }
0x1ab0   :  { %v1839_v63 = vld [vmem:[#allocation3 + $0x8] sm:$0x3]  ;;  %v1838_v0 = vld [vmem:[#allocation3] sm:$0xff] }
0x1ab1   :  { %v1845_v1 = vadd.f32 %v2311_v62, %v1839_v63  ;;  %v1844_v2 = vadd.f32 %v2311_v62, %v1838_v0 }
0x1ab3   :  { %v1847_v7 = vadd.f32 %v1845_v1, %v2875_v6  ;;  %v1846_v9 = vadd.f32 %v1844_v2, %v2869_v5 }
0x1ab5   :  { %v1854_v10 = vsel %vm1853_vm9, %v1847_v7, 0.0  ;;  %v1850_v50 = vsel %vm259_vm1, %v1846_v9, 0.0 }
0x1ab6   :  { %1855 = vadd.xlane.f32.xlu1 %v1854_v10  ;;  %1851 = vadd.xlane.f32.xlu0 %v1850_v50 }
0x1b29   :  { %v1856_v6 = vpop.xlane.xlu1 %1855  ;;  %v1852_v5 = vpop.xlane.xlu0 %1851 }
0x1b2a   :  { %v1864_v16 = vmul.f32 %v3039_v15, %v1852_v5  ;;  %v1865_v18 = vmul.f32 %v3039_v15, %v1856_v6 }
0x1b2c   :  { %v1866_v19 = vsub.f32 %v1846_v9, %v1864_v16  ;;  %v1867_v4 = vsub.f32 %v1847_v7, %v1865_v18  ;;  %v2315_v7 = vld [vmem:[%s3120_s10] ss:$0 sm:$0xff] }
0x1b2e   :  { %v1868_v20 = vmul.f32 %v1866_v19, %v1866_v19  ;;  %v1869_v23 = vmul.f32 %v1867_v4, %v1867_v4 }
0x1b30   :  { %v1870_v22 = vsel %vm259_vm1, %v1868_v20, 0.0  ;;  %v1873_v25 = vsel %vm1853_vm9, %v1869_v23, 0.0 }
0x1b31   :  { %1871 = vadd.xlane.f32.xlu2 %v1870_v22 }
0x1b39   :  { %1874 = vadd.xlane.f32.xlu2 %v1873_v25 }
0x1ba4   :  { %v1872_v28 = vpop.xlane.xlu2 %1871 }
0x1ba5   :  { %v1876_v31 = vmul.f32 %v1872_v28, %v3039_v15 }
0x1ba7   :  { %v1878_v3 = vadd.f32 1e-05, %v1876_v31 }
0x1ba9   :  { %2402 = vrsqrt.f32 %v1878_v3  ;;  %vm1886_vm7 = vweird.f32 %v1878_v3 }
0x1bac   :  { %v1875_v34 = vpop.xlane.xlu2 %1874 }
0x1bad   :  { %v1877_v35 = vmul.f32 %v1875_v34, %v3039_v15 }
0x1baf   :  { %v2403_v36 = vpop.eup %2402  ;;  %v1879_v17 = vadd.f32 1e-05, %v1877_v35 }
0x1bb0   :  { %v1881_v38 = vmul.f32 %v2403_v36, %v1878_v3  ;;  %vm1887_vm0 = vweird.f32 %v2403_v36 }
0x1bb1   :  { %2404 = vrsqrt.f32 %v1879_v17  ;;  %vm1888_vm12 = vmor %vm1886_vm7, %vm1887_vm0  ;;  %vm1896_vm10 = vweird.f32 %v1879_v17 }
0x1bb2   :  { %v1882_v39 = vmul.f32 %v2403_v36, %v1881_v38  ;;  %v2055_v38 = vld [vmem:[%s2662_s6 + $0x18] sm:$0xff] }
0x1bb3   :  { %2072 = vmatpush.msrb.mxu1 %v2055_v38  ;;  %2102 = vmatpush.msrb.mxu2 %v2055_v38 }
0x1bb4   :  { %v1883_v40 = vmul.f32 0.5, %v1882_v39  ;;  %v2054_v39 = vld [vmem:[%s2662_s6 + $0x10] sm:$0xff] }
0x1bb5   :  { %2073 = vmatpush.msrb.mxu1 %v2054_v39  ;;  %2103 = vmatpush.msrb.mxu2 %v2054_v39 }
0x1bb6   :  { %v1884_v41 = vsub.f32 1.5, %v1883_v40  ;;  %v2053_v40 = vld [vmem:[%s2662_s6 + $0x8] sm:$0xff] }
0x1bb7   :  { %v2405_v42 = vpop.eup %2404  ;;  %2074 = vmatpush.msrb.mxu1 %v2053_v40  ;;  %2104 = vmatpush.msrb.mxu2 %v2053_v40 }
0x1bb8   :  { %v1885_v43 = vmul.f32 %v2403_v36, %v1884_v41  ;;  %v1891_v44 = vmul.f32 %v2405_v42, %v1879_v17  ;;  %vm1897_vm13 = vweird.f32 %v2405_v42  ;;  %v2052_v41 = vld [vmem:[%s2662_s6] sm:$0xff]  ;;  %s2502_s6 = smov [#allocation6]  }
0x1bb9   :  { %vm1898_vm14 = vmor %vm1896_vm10, %vm1897_vm13  ;;  %2075 = vmatpush.msrb.mxu1 %v2052_v41  ;;  %2105 = vmatpush.msrb.mxu2 %v2052_v41  ;;  %s2127_s22 = sshll.u32 %s2502_s6, 4  ;;  %s2128_s22 = int_to_ptr.vmem [resolvable:$true] %s2127_s22 }
0x1bba   :  { %v1889_v46 = vsel %vm1888_vm12, %v2403_v36, %v1885_v43  ;;  %v1892_v21 = vmul.f32 %v2405_v42, %v1891_v44 }
0x1bbb   :  { %v1900_v24 = vmul.f32 %v1889_v46, %v1866_v19 }
0x1bbc   :  { %v1893_v26 = vmul.f32 0.5, %v1892_v21 }
0x1bbd   :  { %v1905_v48 = vmul.f32 %v2312_v45, %v1900_v24 }
0x1bbe   :  { %v1894_v51 = vsub.f32 1.5, %v1893_v26 }
0x1bbf   :  { %v1910_v29 = vadd.f32 %v2313_v47, %v1905_v48  ;;  %v2318_v48 = vld [vmem:[%s3123_s16] ss:$0 sm:$0xff] }
0x1bc0   :  { %v1895_v52 = vmul.f32 %v2405_v42, %v1894_v51 }
0x1bc1   :  { %2254 = vmatmul.msk.f32.vlgmr.msrb.gmra.mxu3 %vm259_vm1, %v1910_v29 }
0x1bc2   :  { %v1899_v53 = vsel %vm1898_vm14, %v2405_v42, %v1895_v52  ;;  %v2319_v52 = vld [vmem:[%s3124_s18] ss:$0 sm:$0xff] }
0x1bc3   :  { %v1901_v54 = vmul.f32 %v1899_v53, %v1867_v4 }
0x1bc5   :  { %v1906_v55 = vmul.f32 %v2312_v45, %v1901_v54 }
0x1bc7   :  { %v1911_v56 = vadd.f32 %v2313_v47, %v1906_v55 }
0x1bc9   :  { %2255 = vmatmul.msk.f32.gmra.mxu3 %vm259_vm1, %v1911_v56 }
0x1c44   :  { %v1943_v61 = vpop.f32.mrf.mxu3 }
0x1c45   :  { %v1944_v62 = vadd.f32 %v2314_v59, %v1943_v61 }
0x1c47   :  { %v1949_v63 = vmax.f32 %v1944_v62, 0.0 }
0x1c49   :  { %2256 = vmatmul.msk.f32.vlgmr.msrb.gmra.mxu0 %vm259_vm1, %v1949_v63 }
0x1c4c   :  { %v1946_v0 = vpop.f32.mrf.mxu3 }
0x1c4d   :  { %v1947_v1 = vadd.f32 %v2314_v59, %v1946_v0 }
0x1c4f   :  { %v1950_v2 = vmax.f32 %v1947_v1, 0.0 }
0x1c51   :  { %2257 = vmatmul.msk.f32.gmra.mxu0 %vm259_vm1, %v1950_v2 }
0x1cc6   :  { %v1982_v9 = vpop.f32.mrf.mxu0 }
0x1cc7   :  { %v1983_v10 = vadd.f32 %v2315_v7, %v1982_v9 }
0x1cc9   :  { %v1987_v50 = vadd.f32 %v1983_v10, %v1910_v29 }
0x1ccb   :  { %v1990_v11 = vsel %vm259_vm1, %v1987_v50, 0.0 }
0x1ccc   :  { %1991 = vadd.xlane.f32.xlu0 %v1990_v11 }
0x1cce   :  { %v1985_v57 = vpop.f32.mrf.mxu0 }
0x1d3f   :  { %v1992_v60 = vpop.xlane.xlu0 %1991 }
0x1d40   :  { %v1993_v58 = vmul.f32 %v1992_v60, %v3039_v15 }
0x1d42   :  { %v1994_v13 = vsub.f32 %v1987_v50, %v1993_v58 }
0x1d44   :  { %v1995_v14 = vmul.f32 %v1994_v13, %v1994_v13 }
0x1d46   :  { %v1996_v6 = vsel %vm259_vm1, %v1995_v14, 0.0 }
0x1d47   :  { %1997 = vadd.xlane.f32.xlu1 %v1996_v6 }
0x1dba   :  { %v1998_v5 = vpop.xlane.xlu1 %1997 }
0x1dbb   :  { %v1999_v16 = vmul.f32 %v1998_v5, %v3039_v15 }
0x1dbd   :  { %v2000_v18 = vadd.f32 1e-05, %v1999_v16 }
0x1dbf   :  { %2406 = vrsqrt.f32 %v2000_v18  ;;  %vm2007_vm2 = vweird.f32 %v2000_v18 }
0x1dc5   :  { %v2407_v19 = vpop.eup %2406 }
0x1dc6   :  { %v2002_v20 = vmul.f32 %v2407_v19, %v2000_v18  ;;  %vm2008_vm15 = vweird.f32 %v2407_v19 }
0x1dc7   :  { %vm2009_vm3 = vmor %vm2007_vm2, %vm2008_vm15 }
0x1dc8   :  { %v2003_v4 = vmul.f32 %v2407_v19, %v2002_v20 }
0x1dca   :  { %v2004_v22 = vmul.f32 0.5, %v2003_v4 }
0x1dcc   :  { %v2005_v23 = vsub.f32 1.5, %v2004_v22 }
0x1dce   :  { %v2006_v25 = vmul.f32 %v2407_v19, %v2005_v23 }
0x1dd0   :  { %v2010_v12 = vsel %vm2009_vm3, %v2407_v19, %v2006_v25 }
0x1dd1   :  { %v2011_v37 = vmul.f32 %v2010_v12, %v1994_v13 }
0x1dd3   :  { %v2015_v28 = vmul.f32 %v2316_v8, %v2011_v37 }
0x1dd5   :  { %v2019_v31 = vadd.f32 %v2317_v27, %v2015_v28 }
0x1dd7   :  { %v2022_v3 = vsel %vm259_vm1, %v2019_v31, 0.0 }
0x1dd8   :  { %2023 = vadd.xlane.f32.xlu0 %v2022_v3 }
0x1e4b   :  { %v2024_v33 = vpop.xlane.xlu0 %2023 }
0x1e4c   :  { %v2025_v34 = vmul.f32 %v2024_v33, %v3039_v15 }
0x1e4e   :  { %v2026_v35 = vsub.f32 %v2019_v31, %v2025_v34 }
0x1e50   :  { %v2027_v36 = vmul.f32 %v2026_v35, %v2026_v35 }
0x1e52   :  { %v2028_v17 = vsel %vm259_vm1, %v2027_v36, 0.0 }
0x1e53   :  { %2029 = vadd.xlane.f32.xlu2 %v2028_v17 }
0x1ec6   :  { %v2030_v42 = vpop.xlane.xlu2 %2029 }
0x1ec7   :  { %v2031_v43 = vmul.f32 %v2030_v42, %v3039_v15 }
0x1ec9   :  { %v2032_v44 = vadd.f32 1e-05, %v2031_v43 }
0x1ecb   :  { %2408 = vrsqrt.f32 %v2032_v44  ;;  %vm2039_vm5 = vweird.f32 %v2032_v44 }
0x1ed1   :  { %v2409_v45 = vpop.eup %2408 }
0x1ed2   :  { %v2034_v46 = vmul.f32 %v2409_v45, %v2032_v44  ;;  %vm2040_vm4 = vweird.f32 %v2409_v45 }
0x1ed3   :  { %vm2041_vm6 = vmor %vm2039_vm5, %vm2040_vm4 }
0x1ed4   :  { %v2035_v21 = vmul.f32 %v2409_v45, %v2034_v46 }
0x1ed6   :  { %v2036_v24 = vmul.f32 0.5, %v2035_v21 }
0x1ed8   :  { %v2037_v47 = vsub.f32 1.5, %v2036_v24 }
0x1eda   :  { %v2038_v26 = vmul.f32 %v2409_v45, %v2037_v47 }
0x1edc   :  { %v2042_v51 = vsel %vm2041_vm6, %v2409_v45, %v2038_v26 }
0x1edd   :  { %v2043_v29 = vmul.f32 %v2042_v51, %v2026_v35 }
0x1edf   :  { %v2047_v53 = vmul.f32 %v2318_v48, %v2043_v29 }
0x1ee1   :  { %v2051_v15 = vadd.f32 %v2319_v52, %v2047_v53 }
0x1ee3   :  { %2258 = vmatmul.msk.f32.vlgmr.msrb.gmra.mxu1 %vm259_vm1, %v2051_v15  ;;  %v2087_v54 = vrot.slane %v2051_v15, 5 }
0x1ee5   :  { %2259 = vmatmul.msk.f32.vlgmr.msrb.gmra.mxu2 %vm259_vm1, %v2087_v54 }
0x1ee6   :  { %2433 = shalt.err (!%p2430_p4)
}
0x1ee7   :  { %2132 = dma.vmem_to_hbm [thread:$0]  %s2128_s22, 128, %s2130_s23, [#allocation7]   ;;  %v2056_v55 = vld [vmem:[%s2667_s20] sm:$0x1]  ;;  %vm2080_vm1 = vcmask 40960  }
0x1ee8   :  { %v2086_v32 = vld [vmem:[%s2667_s20] sm:$0x1]  ;;  %s2503_s2 = smov [#allocation4]   ;;  %s2118_s9 = sshll.u32 %s2672_s19, 4  ;;  %s2119_s9 = int_to_ptr.hbm [resolvable:$true] %s2118_s9 }
0x1ee9   :  { %s2116_s0 = sshll.u32 %s2503_s2, 4  ;;  %s2446_s4 = sshra.s32 %s2119_s9, 4  ;;  %s2117_s0 = int_to_ptr.vmem [resolvable:$true] %s2116_s0  ;;  %s2447_s4 = int_to_ptr.hbm [resolvable:$true] %s2446_s4 }
0x1eea   :  { %s2448_s5 = scalar_lea.hbm %s2447_s4, 2  ;;  %s2450_s13 = scalar_lea.hbm %s2672_s19, 2 }
0x1eeb   :  { %p2449_p5 = scmp.ne.s32.totalorder %s2447_s4, %s2448_s5  ;;  %p2451_p6 = scmp.lt.s32.totalorder %s2447_s4, %s2672_s19 }
0x1eec   :  { %p2452_p7 = scmp.lt.s32.totalorder %s2450_s13, %s2448_s5 }
0x1eee   :  { %p2453_p8 = por %p2452_p7, %p2451_p6 }
0x1ef0   :  { %p2454_p9 = pnand %p2453_p8, %p2449_p5 }
0x1f60   :  { %v2077_v56 = vpop.f32.mrf.mxu1 }
0x1f61   :  { %v2078_v49 = vadd.f32 %v2077_v56, %v2056_v55 }
0x1f63   :  { %2081 = vst.msk [vmem:[#allocation4] sm:$0x1] %vm2080_vm1, %v2078_v49 }
0x1f68   :  { %v2107_v30 = vpop.f32.mrf.mxu2 }
0x1f69   :  { %v2108_v59 = vadd.f32 %v2107_v30, %v2086_v32 }
0x1f6b   :  { %2110 = vst.msk [vmem:[#allocation4 + $0x1] sm:$0x1] %vm2080_vm1, %v2108_v59 }
0x1f6c   :  { %2457 = shalt.err (!%p2454_p9)
}
0x1f6d   :  { %2121 = dma.vmem_to_hbm [thread:$0]  %s2117_s0, 32, %s2119_s9, [#allocation5]  }
0x1f6e   :  { %2458 = dma.done.wait [#allocation5], 32  }
0x1f6f   :  { %2459 = vsyncadd [#allocation5], 4294967264 }
0x1f70   :  { %2460 = dma.done.wait [#allocation7], 128  }
0x1f71   :  { %2461 = vsyncadd [#allocation7], 4294967168 }
0x1f72   :  { %2141 = vsyncpa [#allocation5], 1 }
0x1f73   :  { %2142 = vsyncpa [#allocation7], 1 }

</bundles_post_ra>
